<compile_context>
chip_gen: v6e
topology: v6e:2x2x1
jax: 0.10.0
libtpu: 0.0.40
codegen_flags: <defaults>
</compile_context>

<pallas_src>
import functools

import jax
import jax.numpy as jnp
import numpy as np
from jax import lax
from jax.experimental import pallas as pl
from jax.experimental.pallas import tpu as pltpu


# ---------------------------------------------------------------------------
# in-kernel helpers
# ---------------------------------------------------------------------------
def _mm(a, b):
    """a @ b : bf16 MXU operands, f32 accumulation."""
    return lax.dot_general(
        a.astype(jnp.bfloat16), b.astype(jnp.bfloat16),
        (((1,), (0,)), ((), ())),
        preferred_element_type=jnp.float32)


def _mm_nt(a, b):
    """a @ b.T (contract last dims) without an explicit transpose."""
    return lax.dot_general(
        a.astype(jnp.bfloat16), b.astype(jnp.bfloat16),
        (((1,), (1,)), ((), ())),
        preferred_element_type=jnp.float32)


def _layernorm(x, w, b, eps=1e-6):
    mu = jnp.mean(x, axis=-1, keepdims=True)
    var = jnp.mean((x - mu) ** 2, axis=-1, keepdims=True)
    return (x - mu) * lax.rsqrt(var + eps) * w + b


def _theta_shift(x, cos, sin_ne, sin_od):
    # x*cos + multiply_by_i(x)*sin, with the even/odd parity select folded into
    # sign/zero-masked sin tables built on host: two XLU rolls + VPU fma only.
    # Wrap-around / cross-pair roll contamination is multiplied by exactly 0.
    n = x.shape[-1]
    nxt = pltpu.roll(x, n - 1, axis=x.ndim - 1)   # element i <- x[i+1]
    prv = pltpu.roll(x, 1, axis=x.ndim - 1)       # element i <- x[i-1]
    return x * cos + nxt * sin_ne + prv * sin_od


def _heads_per_group(num_heads, head_dim):
    """Group heads so accumulator writes cover >=128 lanes when head_dim < 128."""
    if head_dim >= 128 or 128 % head_dim != 0:
        return 1
    hpg = min(num_heads, 128 // head_dim)
    while num_heads % hpg:
        hpg -= 1
    return hpg


def _vmem_limit_bytes():
    """Generation-aware scoped-VMEM request (~5/8 of physical, capped)."""
    cap = 128 * 1024 * 1024
    try:
        cap = int(pltpu.get_tpu_info().vmem_capacity_bytes)
    except Exception:
        pass
    return int(min(cap * 5 // 8, 96 * 1024 * 1024))


# ---------------------------------------------------------------------------
# kernel 1: LayerNorm1 + fused QKVG projection + xPos rotation + decay folding
# ---------------------------------------------------------------------------
def qkvg_proj_kernel(x_ref, ln1_w, ln1_b, wqkvg, bqkvg,
                     cos, sne, sod, qdec, kdec,
                     q_ref, k_ref, v_ref, g_ref, *, d_model):
    D = d_model
    h1 = _layernorm(x_ref[0], ln1_w[...], ln1_b[...])
    p = _mm(h1, wqkvg[...]) + bqkvg[...]                       # (ts, 4D) f32
    q = _theta_shift(p[:, 0:D], cos[...], sne[...], sod[...]) * qdec[...]
    k = _theta_shift(p[:, D:2 * D], cos[...], sne[...], sod[...]) * kdec[...]
    q_ref[0] = q.astype(jnp.bfloat16)
    k_ref[0] = k.astype(jnp.bfloat16)
    v_ref[0] = p[:, 2 * D:3 * D].astype(jnp.bfloat16)
    g_ref[0] = jax.nn.silu(p[:, 3 * D:4 * D])                  # f32 gate


# ---------------------------------------------------------------------------
# kernel 2: causal retention accumulation + GroupNorm + gate + out_proj + residual 1
# ---------------------------------------------------------------------------
def retention_kernel(x_ref, q_ref, g_ref, k_ref, v_ref, lg_ref, wo, bo,
                     y_ref, acc_scr, *, num_heads, tq, tk):
    qi = pl.program_id(1)
    ki = pl.program_id(2)
    nk = pl.num_programs(2)
    D = acc_scr.shape[-1]
    d = D // num_heads
    hpg = _heads_per_group(num_heads, d)

    @pl.when(ki == 0)
    def _init():
        acc_scr[...] = jnp.zeros_like(acc_scr)

    # skip compute for fully-future kv tiles (their DMA is also skipped because the
    # wrapper clamps the kv block index in the index_map)
    @pl.when(ki * tk < (qi + 1) * tq)
    def _accumulate():
        shift = qi * tq - ki * tk                              # chunk offset
        rows = lax.broadcasted_iota(jnp.int32, (tq, tk), 0)
        cols = lax.broadcasted_iota(jnp.int32, (tq, tk), 1)
        keep = (rows + shift) >= cols                          # causal, head-independent
        # factored decay: per-head per-tile scalar gamma^(qi*tq - ki*tk) -> H exps/step
        scale = jnp.exp(shift.astype(jnp.float32) * lg_ref[...])   # (1, H)

        q = q_ref[0]
        k = k_ref[0]
        v = v_ref[0]
        for g0 in range(0, num_heads, hpg):
            parts = []
            for h in range(g0, g0 + hpg):
                lo = h * d
                sim = _mm_nt(q[:, lo:lo + d], k[:, lo:lo + d])       # (tq, tk) f32
                sim = jnp.where(keep, sim * scale[:, h:h + 1], 0.0)
                parts.append(_mm(sim, v[:, lo:lo + d]))              # (tq, d) f32
            blk = parts[0] if hpg == 1 else jnp.concatenate(parts, axis=-1)
            acc_scr[:, g0 * d:(g0 + hpg) * d] += blk

    @pl.when(ki == nk - 1)
    def _finalize():
        # GroupNorm(num_groups=num_heads, affine=False, eps=1e-6): per (row, head)
        parts = []
        for h in range(num_heads):
            lo = h * d
            rh = acc_scr[:, lo:lo + d]
            mu = jnp.mean(rh, axis=-1, keepdims=True)
            var = jnp.mean((rh - mu) ** 2, axis=-1, keepdims=True)
            parts.append((rh - mu) * lax.rsqrt(var + 1e-6))
        ret = parts[0] if num_heads == 1 else jnp.concatenate(parts, axis=-1)
        msr = _mm(ret * g_ref[0], wo[...]) + bo[...]
        y_ref[0] = x_ref[0] + msr                              # residual 1


# ---------------------------------------------------------------------------
# kernel 3: LayerNorm2 + FFN (streamed over dim_feedforward) + residual 2
# ---------------------------------------------------------------------------
def ffn_kernel(x_ref, ln2_w, ln2_b, w1_ref, b1_ref, w2_ref, b2_ref,
               out_ref, h2_scr, acc_scr):
    f = pl.program_id(2)
    nf = pl.num_programs(2)

    @pl.when(f == 0)
    def _init():
        h2_scr[...] = _layernorm(x_ref[0], ln2_w[...], ln2_b[...])
        acc_scr[...] = jnp.zeros_like(acc_scr)

    h = jax.nn.silu(_mm(h2_scr[...], w1_ref[...]) + b1_ref[...])
    acc_scr[...] += _mm(h, w2_ref[...])

    @pl.when(f == nf - 1)
    def _finalize():
        out_ref[0] = x_ref[0] + acc_scr[...] + b2_ref[...]     # residual 2


# ---------------------------------------------------------------------------
# parameters / constants (glue)
# ---------------------------------------------------------------------------
def init_params(key, d_model, dim_feedforward):
    def xavier(k, fan_in, fan_out):
        std = (2.0 / (fan_in + fan_out)) ** 0.5
        return jax.random.normal(k, (fan_in, fan_out), jnp.float32) * std  # (in, out)

    ks = jax.random.split(key, 7)
    p = {}
    p["ln1_w"] = jnp.ones((1, d_model), jnp.float32)
    p["ln1_b"] = jnp.zeros((1, d_model), jnp.float32)
    p["wq"] = xavier(ks[0], d_model, d_model); p["bq"] = jnp.zeros((1, d_model), jnp.float32)
    p["wk"] = xavier(ks[1], d_model, d_model); p["bk"] = jnp.zeros((1, d_model), jnp.float32)
    p["wv"] = xavier(ks[2], d_model, d_model); p["bv"] = jnp.zeros((1, d_model), jnp.float32)
    p["wg"] = xavier(ks[3], d_model, d_model); p["bg"] = jnp.zeros((1, d_model), jnp.float32)
    p["wo"] = xavier(ks[4], d_model, d_model); p["bo"] = jnp.zeros((1, d_model), jnp.float32)
    p["ln2_w"] = jnp.ones((1, d_model), jnp.float32)
    p["ln2_b"] = jnp.zeros((1, d_model), jnp.float32)
    p["w1"] = xavier(ks[5], d_model, dim_feedforward)
    p["b1"] = jnp.zeros((1, dim_feedforward), jnp.float32)
    p["w2"] = xavier(ks[6], dim_feedforward, d_model)
    p["b2"] = jnp.zeros((1, d_model), jnp.float32)
    return p


def build_constants(num_heads, seq_len, d_model):
    head_dim = d_model // num_heads
    assert head_dim % 2 == 0 and head_dim % 8 == 0

    # _build_position_thetas + sign-folded sin tables (for the 2-roll rotation)
    xs = np.linspace(0.0, 1.0, head_dim // 2)
    thetas = np.repeat(1.0 / (10000.0 ** xs), 2)                 # (head_dim,)
    angles = np.arange(seq_len)[:, None] * thetas[None, :]       # (N, head_dim)
    sin = np.tile(np.sin(angles), (1, num_heads))                # (N, D)
    cos = np.tile(np.cos(angles), (1, num_heads))                # (N, D)
    even = (np.arange(d_model) % 2 == 0)[None, :]
    sin_ne = np.where(even, -sin, 0.0)   # pairs with roll giving x[i+1]
    sin_od = np.where(even, 0.0, sin)    # pairs with roll giving x[i-1]

    # _build_decay_gammas -> per-head log-gammas (decay factored in-kernel)
    xg = np.linspace(np.log(1.0 / 32), np.log(1.0 / 512), num_heads)
    gammas = 1.0 - np.exp(xg)                                     # (H,)
    log_gammas = np.log(gammas).reshape(1, num_heads)

    f32 = lambda a: jnp.asarray(a, jnp.float32)
    kernel_consts = (f32(cos), f32(sin_ne), f32(sin_od), f32(log_gammas))
    ref_consts = (f32(sin), f32(cos), f32(gammas))
    return kernel_consts, ref_consts


def _const_spec(a):
    nd = a.ndim
    return pl.BlockSpec(a.shape, lambda *_, nd=nd: (0,) * nd)


# ---------------------------------------------------------------------------
# wrapper
# ---------------------------------------------------------------------------
def retnet_decoder_layer(x, params, kernel_consts, num_heads,
                         *, tq=None, tk=None, ts=None, tf=None):
    B, N, D = x.shape
    assert D % num_heads == 0
    H = num_heads
    d = D // H
    F = params["w1"].shape[1]
    cos, sin_ne, sin_od, log_gammas = kernel_consts

    tq = min(tq or 128, N)
    tk = min(tk or 128, N)
    ts = min(ts or 128, N)
    tf = tf or min(F, 512)
    assert N % tq == 0 and N % tk == 0 and N % ts == 0 and F % tf == 0
    assert tq % 8 == 0 and tk % 8 == 0 and ts % 8 == 0
    nq, nk, ns, nf = N // tq, N // tk, N // ts, F // tf

    bf16 = jnp.bfloat16
    inv_scale = 1.0 / float(d) ** 0.5
    vmem_limit = _vmem_limit_bytes()

    # fused projection weight (one well-shaped (D,4D) GEMM instead of 4 (D,D) ones)
    wqkvg = jnp.concatenate([params["wq"], params["wk"], params["wv"], params["wg"]],
                            axis=1).astype(bf16)
    bqkvg = jnp.concatenate([params["bq"], params["bk"], params["bv"], params["bg"]], axis=1)

    # chunkwise decay factorization: gamma^(i-j) = gamma^(i%tq) * gamma^(qi*tq-ki*tk) * gamma^(-(j%tk))
    # fold the tile-relative row/col factors (plus 1/sqrt(d)) into Q / K once.
    pos = jnp.arange(N, dtype=jnp.int32)
    lg_col = jnp.repeat(log_gammas[0], d)[None, :]                         # (1, D)
    qdec = jnp.exp((pos % tq).astype(jnp.float32)[:, None] * lg_col) * inv_scale
    kdec = jnp.exp(-(pos % tk).astype(jnp.float32)[:, None] * lg_col)

    # ---- call 1: projection (grid over batch x seq tiles) -------------------
    qp, kp, vp, gp = pl.pallas_call(
        functools.partial(qkvg_proj_kernel, d_model=D),
        out_shape=(jax.ShapeDtypeStruct((B, N, D), bf16),
                   jax.ShapeDtypeStruct((B, N, D), bf16),
                   jax.ShapeDtypeStruct((B, N, D), bf16),
                   jax.ShapeDtypeStruct((B, N, D), jnp.float32)),
        grid=(B, ns),
        in_specs=[
            pl.BlockSpec((1, ts, D), lambda b, s: (b, s, 0)),
            _const_spec(params["ln1_w"]), _const_spec(params["ln1_b"]),
            _const_spec(wqkvg), _const_spec(bqkvg),
            pl.BlockSpec((ts, D), lambda b, s: (s, 0)),   # cos
            pl.BlockSpec((ts, D), lambda b, s: (s, 0)),   # sin_ne
            pl.BlockSpec((ts, D), lambda b, s: (s, 0)),   # sin_od
            pl.BlockSpec((ts, D), lambda b, s: (s, 0)),   # qdec
            pl.BlockSpec((ts, D), lambda b, s: (s, 0)),   # kdec
        ],
        out_specs=(pl.BlockSpec((1, ts, D), lambda b, s: (b, s, 0)),
                   pl.BlockSpec((1, ts, D), lambda b, s: (b, s, 0)),
                   pl.BlockSpec((1, ts, D), lambda b, s: (b, s, 0)),
                   pl.BlockSpec((1, ts, D), lambda b, s: (b, s, 0))),
        compiler_params=pltpu.CompilerParams(
            dimension_semantics=("parallel", "parallel"),
            vmem_limit_bytes=vmem_limit),
    )(x, params["ln1_w"], params["ln1_b"], wqkvg, bqkvg,
      cos, sin_ne, sin_od, qdec, kdec)

    # ---- call 2: retention core (grid batch x q tiles x kv tiles) ----------
    # clamp the kv block index so causally-future tiles are never DMA'd
    def kv_clamp(b, i, j):
        return (b, jnp.minimum(j, (tq * (i + 1) - 1) // tk), 0)

    y1 = pl.pallas_call(
        functools.partial(retention_kernel, num_heads=H, tq=tq, tk=tk),
        out_shape=jax.ShapeDtypeStruct((B, N, D), jnp.float32),
        grid=(B, nq, nk),
        in_specs=[
            pl.BlockSpec((1, tq, D), lambda b, i, j: (b, i, 0)),   # x (residual)
            pl.BlockSpec((1, tq, D), lambda b, i, j: (b, i, 0)),   # Q (bf16, pre-scaled)
            pl.BlockSpec((1, tq, D), lambda b, i, j: (b, i, 0)),   # gate (f32, silu'ed)
            pl.BlockSpec((1, tk, D), kv_clamp),                     # K (bf16, pre-scaled)
            pl.BlockSpec((1, tk, D), kv_clamp),                     # V (bf16)
            _const_spec(log_gammas),
            _const_spec(params["wo"]),
            _const_spec(params["bo"]),
        ],
        out_specs=pl.BlockSpec((1, tq, D), lambda b, i, j: (b, i, 0)),
        scratch_shapes=[pltpu.VMEM((tq, D), jnp.float32)],          # retention accumulator
        compiler_params=pltpu.CompilerParams(
            dimension_semantics=("parallel", "parallel", "arbitrary"),
            vmem_limit_bytes=vmem_limit),
    )(x, qp, gp, kp, vp, log_gammas, params["wo"].astype(bf16), params["bo"])

    # ---- call 3: FFN (grid batch x seq tiles x F chunks) -------------------
    out = pl.pallas_call(
        ffn_kernel,
        out_shape=jax.ShapeDtypeStruct((B, N, D), jnp.float32),
        grid=(B, ns, nf),
        in_specs=[
            pl.BlockSpec((1, ts, D), lambda b, i, f: (b, i, 0)),
            _const_spec(params["ln2_w"]), _const_spec(params["ln2_b"]),
            pl.BlockSpec((D, tf), lambda b, i, f: (0, f)),
            pl.BlockSpec((1, tf), lambda b, i, f: (0, f)),
            pl.BlockSpec((tf, D), lambda b, i, f: (f, 0)),
            _const_spec(params["b2"]),
        ],
        out_specs=pl.BlockSpec((1, ts, D), lambda b, i, f: (b, i, 0)),
        scratch_shapes=[pltpu.VMEM((ts, D), jnp.float32),           # cached LN2(x)
                        pltpu.VMEM((ts, D), jnp.float32)],          # FFN accumulator
        compiler_params=pltpu.CompilerParams(
            dimension_semantics=("parallel", "parallel", "arbitrary"),
            vmem_limit_bytes=vmem_limit),
    )(y1, params["ln2_w"], params["ln2_b"],
      params["w1"].astype(bf16), params["b1"],
      params["w2"].astype(bf16), params["b2"])

    return out


# ---------------------------------------------------------------------------
# pure-JAX f32 reference (correctness check only)
# ---------------------------------------------------------------------------
def reference(x, p, sin, cos, gammas):
    HI = lax.Precision.HIGHEST
    B, N, D = x.shape
    H = gammas.shape[0]
    d = D // H
    scale = float(d) ** 0.5

    def ln(t, w, b, eps=1e-6):
        mu = t.mean(-1, keepdims=True)
        var = ((t - mu) ** 2).mean(-1, keepdims=True)
        return (t - mu) / jnp.sqrt(var + eps) * w + b

    def lin(t, w, b):
        return jnp.dot(t, w, precision=HI) + b

    def mul_i(t):
        tr = t.reshape(*t.shape[:-1], -1, 2)
        return jnp.stack([-tr[..., 1], tr[..., 0]], axis=-1).reshape(t.shape)

    qpos = jnp.arange(N, dtype=jnp.float32)[:, None]
    kpos = jnp.arange(N, dtype=jnp.float32)[None, :]
    dist = jnp.abs(qpos - kpos)
    mask = gammas[:, None, None] ** dist[None]
    mask = jnp.where((kpos > qpos)[None], 0.0, mask)          # (H, N, N)

    h1 = ln(x, p["ln1_w"], p["ln1_b"])
    q = lin(h1, p["wq"], p["bq"])
    k = lin(h1, p["wk"], p["bk"])
    v = lin(h1, p["wv"], p["bv"])
    g = lin(h1, p["wg"], p["bg"])
    q = q * cos + mul_i(q) * sin
    k = k * cos + mul_i(k) * sin

    def split(t):
        return t.reshape(B, N, H, d).transpose(0, 2, 1, 3)

    qh, kh, vh = split(q), split(k) / scale, split(v)
    sim = jnp.einsum("bhnd,bhsd->bhns", qh, kh, precision=HI) * mask[None]
    ret = jnp.einsum("bhns,bhsd->bhnd", sim, vh, precision=HI)
    mu = ret.mean(-1, keepdims=True)
    var = ((ret - mu) ** 2).mean(-1, keepdims=True)
    ret = (ret - mu) / jnp.sqrt(var + 1e-6)
    ret = ret.transpose(0, 2, 1, 3).reshape(B, N, D)
    msr = lin(ret * jax.nn.silu(g), p["wo"], p["bo"])
    x2 = x + msr
    h2 = ln(x2, p["ln2_w"], p["ln2_b"])
    ff = lin(jax.nn.silu(lin(h2, p["w1"], p["b1"])), p["w2"], p["b2"])
    return x2 + ff


if __name__ == "__main__":
    # batch, seq, d_model, nhead, dim_feedforward (small, but exercises the seq-tiled grids)
    B, N, D, H, F = 2, 32, 64, 2, 128
    tq = tk = ts = 16                        # retention grid = (2, 2, 2), proj/FFN grids tiled

    key = jax.random.PRNGKey(0)
    kx, kp = jax.random.split(key)
    x = jax.random.normal(kx, (B, N, D), jnp.float32)
    params = init_params(kp, D, F)
    kernel_consts, ref_consts = build_constants(H, N, D)

    out = retnet_decoder_layer(x, params, kernel_consts, H, tq=tq, tk=tk, ts=ts)
    out = jax.block_until_ready(out)

    ref = reference(x, params, *ref_consts)
    assert out.shape == (B, N, D)
    # bf16 MXU operands with f32 accumulation -> loosened tolerance
    np.testing.assert_allclose(np.asarray(out), np.asarray(ref), rtol=4e-2, atol=4e-2)
    print("KERNEL_OK")
</pallas_src>

<mosaic_0001>
module attributes {stable_mosaic.version = 11 : i64} {
  func.func @qkvg_proj_kernel(%arg0: i32, %arg1: i32, %arg2: memref<1x16x64xf32, #tpu.memory_space<vmem>>, %arg3: memref<1x64xf32, #tpu.memory_space<vmem>>, %arg4: memref<1x64xf32, #tpu.memory_space<vmem>>, %arg5: memref<64x256xbf16, #tpu.memory_space<vmem>>, %arg6: memref<1x256xf32, #tpu.memory_space<vmem>>, %arg7: memref<16x64xf32, #tpu.memory_space<vmem>>, %arg8: memref<16x64xf32, #tpu.memory_space<vmem>>, %arg9: memref<16x64xf32, #tpu.memory_space<vmem>>, %arg10: memref<16x64xf32, #tpu.memory_space<vmem>>, %arg11: memref<16x64xf32, #tpu.memory_space<vmem>>, %arg12: memref<1x16x64xbf16, #tpu.memory_space<vmem>>, %arg13: memref<1x16x64xbf16, #tpu.memory_space<vmem>>, %arg14: memref<1x16x64xbf16, #tpu.memory_space<vmem>>, %arg15: memref<1x16x64xf32, #tpu.memory_space<vmem>>) attributes {dimension_semantics = [#tpu.dimension_semantics<parallel>, #tpu.dimension_semantics<parallel>], iteration_bounds = array<i64: 2, 2>, scalar_prefetch = 0 : i64, scratch_operands = 0 : i64, tpu.core_type = #tpu.core_type<tc>, window_params = [{transform_indices = @transform_0, window_bounds = array<i64: 1, 16, 64>}, {pipeline_mode = #tpu.pipeline_mode<synchronous>, transform_indices = @transform_1, window_bounds = array<i64: 1, 64>}, {pipeline_mode = #tpu.pipeline_mode<synchronous>, transform_indices = @transform_2, window_bounds = array<i64: 1, 64>}, {pipeline_mode = #tpu.pipeline_mode<synchronous>, transform_indices = @transform_3, window_bounds = array<i64: 64, 256>}, {pipeline_mode = #tpu.pipeline_mode<synchronous>, transform_indices = @transform_4, window_bounds = array<i64: 1, 256>}, {transform_indices = @transform_5, window_bounds = array<i64: 16, 64>}, {transform_indices = @transform_6, window_bounds = array<i64: 16, 64>}, {transform_indices = @transform_7, window_bounds = array<i64: 16, 64>}, {transform_indices = @transform_8, window_bounds = array<i64: 16, 64>}, {transform_indices = @transform_9, window_bounds = array<i64: 16, 64>}, {transform_indices = @transform_10, window_bounds = array<i64: 1, 16, 64>}, {transform_indices = @transform_11, window_bounds = array<i64: 1, 16, 64>}, {transform_indices = @transform_12, window_bounds = array<i64: 1, 16, 64>}, {transform_indices = @transform_13, window_bounds = array<i64: 1, 16, 64>}]} {
    %c0 = arith.constant 0 : index
    %c0_0 = arith.constant 0 : index
    %c0_1 = arith.constant 0 : index
    %0 = vector.load %arg2[%c0, %c0_0, %c0_1] : memref<1x16x64xf32, #tpu.memory_space<vmem>>, vector<1x16x64xf32>
    %1 = vector.shape_cast %0 : vector<1x16x64xf32> to vector<16x64xf32>
    %c0_2 = arith.constant 0 : index
    %c0_3 = arith.constant 0 : index
    %2 = vector.load %arg3[%c0_2, %c0_3] : memref<1x64xf32, #tpu.memory_space<vmem>>, vector<1x64xf32>
    %c0_4 = arith.constant 0 : index
    %c0_5 = arith.constant 0 : index
    %3 = vector.load %arg4[%c0_4, %c0_5] : memref<1x64xf32, #tpu.memory_space<vmem>>, vector<1x64xf32>
    %cst = arith.constant dense<0.000000e+00> : vector<16xf32>
    %4 = vector.multi_reduction <add>, %1, %cst [1] : vector<16x64xf32> to vector<16xf32>
    %5 = vector.shape_cast %4 : vector<16xf32> to vector<16x1xf32>
    %cst_6 = arith.constant 6.400000e+01 : f32
    %6 = vector.broadcast %cst_6 : f32 to vector<16x1xf32>
    %7 = arith.divf %5, %6 : vector<16x1xf32>
    %8 = vector.broadcast %7 : vector<16x1xf32> to vector<16x64xf32>
    %9 = arith.subf %1, %8 : vector<16x64xf32>
    %10 = arith.mulf %9, %9 : vector<16x64xf32>
    %cst_7 = arith.constant dense<0.000000e+00> : vector<16xf32>
    %11 = vector.multi_reduction <add>, %10, %cst_7 [1] : vector<16x64xf32> to vector<16xf32>
    %12 = vector.shape_cast %11 : vector<16xf32> to vector<16x1xf32>
    %cst_8 = arith.constant 6.400000e+01 : f32
    %13 = vector.broadcast %cst_8 : f32 to vector<16x1xf32>
    %14 = arith.divf %12, %13 : vector<16x1xf32>
    %15 = vector.broadcast %7 : vector<16x1xf32> to vector<16x64xf32>
    %16 = arith.subf %1, %15 : vector<16x64xf32>
    %cst_9 = arith.constant 9.99999997E-7 : f32
    %17 = vector.broadcast %cst_9 : f32 to vector<16x1xf32>
    %18 = arith.addf %14, %17 : vector<16x1xf32>
    %19 = math.rsqrt %18 : vector<16x1xf32>
    %20 = vector.broadcast %19 : vector<16x1xf32> to vector<16x64xf32>
    %21 = arith.mulf %16, %20 : vector<16x64xf32>
    %22 = vector.broadcast %2 : vector<1x64xf32> to vector<16x64xf32>
    %23 = arith.mulf %21, %22 : vector<16x64xf32>
    %24 = vector.broadcast %3 : vector<1x64xf32> to vector<16x64xf32>
    %25 = arith.addf %23, %24 : vector<16x64xf32>
    %c0_10 = arith.constant 0 : index
    %c0_11 = arith.constant 0 : index
    %26 = vector.load %arg5[%c0_10, %c0_11] : memref<64x256xbf16, #tpu.memory_space<vmem>>, vector<64x256xbf16>
    %27 = arith.truncf %25 : vector<16x64xf32> to vector<16x64xbf16>
    %cst_12 = arith.constant dense<0.000000e+00> : vector<16x256xf32>
    %28 = tpu.matmul %27, %26, %cst_12 {dimension_numbers = #tpu.dot_dimension_numbers<[1], [0], [0], [1], [0, 0, 1, 1], [], []>} : vector<16x64xbf16>, vector<64x256xbf16>, vector<16x256xf32> -> vector<16x256xf32>
    %c0_13 = arith.constant 0 : index
    %c0_14 = arith.constant 0 : index
    %29 = vector.load %arg6[%c0_13, %c0_14] : memref<1x256xf32, #tpu.memory_space<vmem>>, vector<1x256xf32>
    %30 = vector.broadcast %29 : vector<1x256xf32> to vector<16x256xf32>
    %31 = arith.addf %28, %30 : vector<16x256xf32>
    %32 = vector.extract_strided_slice %31 {offsets = [0, 0], sizes = [16, 64], strides = [1, 1]} : vector<16x256xf32> to vector<16x64xf32>
    %c0_15 = arith.constant 0 : index
    %c0_16 = arith.constant 0 : index
    %33 = vector.load %arg7[%c0_15, %c0_16] : memref<16x64xf32, #tpu.memory_space<vmem>>, vector<16x64xf32>
    %c0_17 = arith.constant 0 : index
    %c0_18 = arith.constant 0 : index
    %34 = vector.load %arg8[%c0_17, %c0_18] : memref<16x64xf32, #tpu.memory_space<vmem>>, vector<16x64xf32>
    %c0_19 = arith.constant 0 : index
    %c0_20 = arith.constant 0 : index
    %35 = vector.load %arg9[%c0_19, %c0_20] : memref<16x64xf32, #tpu.memory_space<vmem>>, vector<16x64xf32>
    %c63_i32 = arith.constant 63 : i32
    %36 = tpu.dynamic_rotate %32 by %c63_i32 dim 1 : vector<16x64xf32>, i32 -> vector<16x64xf32>
    %c1_i32 = arith.constant 1 : i32
    %37 = tpu.dynamic_rotate %32 by %c1_i32 dim 1 : vector<16x64xf32>, i32 -> vector<16x64xf32>
    %38 = arith.mulf %32, %33 : vector<16x64xf32>
    %39 = arith.mulf %36, %34 : vector<16x64xf32>
    %40 = arith.addf %38, %39 : vector<16x64xf32>
    %41 = arith.mulf %37, %35 : vector<16x64xf32>
    %42 = arith.addf %40, %41 : vector<16x64xf32>
    %c0_21 = arith.constant 0 : index
    %c0_22 = arith.constant 0 : index
    %43 = vector.load %arg10[%c0_21, %c0_22] : memref<16x64xf32, #tpu.memory_space<vmem>>, vector<16x64xf32>
    %44 = arith.mulf %42, %43 : vector<16x64xf32>
    %45 = vector.extract_strided_slice %31 {offsets = [0, 64], sizes = [16, 64], strides = [1, 1]} : vector<16x256xf32> to vector<16x64xf32>
    %c0_23 = arith.constant 0 : index
    %c0_24 = arith.constant 0 : index
    %46 = vector.load %arg7[%c0_23, %c0_24] : memref<16x64xf32, #tpu.memory_space<vmem>>, vector<16x64xf32>
    %c0_25 = arith.constant 0 : index
    %c0_26 = arith.constant 0 : index
    %47 = vector.load %arg8[%c0_25, %c0_26] : memref<16x64xf32, #tpu.memory_space<vmem>>, vector<16x64xf32>
    %c0_27 = arith.constant 0 : index
    %c0_28 = arith.constant 0 : index
    %48 = vector.load %arg9[%c0_27, %c0_28] : memref<16x64xf32, #tpu.memory_space<vmem>>, vector<16x64xf32>
    %c63_i32_29 = arith.constant 63 : i32
    %49 = tpu.dynamic_rotate %45 by %c63_i32_29 dim 1 : vector<16x64xf32>, i32 -> vector<16x64xf32>
    %c1_i32_30 = arith.constant 1 : i32
    %50 = tpu.dynamic_rotate %45 by %c1_i32_30 dim 1 : vector<16x64xf32>, i32 -> vector<16x64xf32>
    %51 = arith.mulf %45, %46 : vector<16x64xf32>
    %52 = arith.mulf %49, %47 : vector<16x64xf32>
    %53 = arith.addf %51, %52 : vector<16x64xf32>
    %54 = arith.mulf %50, %48 : vector<16x64xf32>
    %55 = arith.addf %53, %54 : vector<16x64xf32>
    %c0_31 = arith.constant 0 : index
    %c0_32 = arith.constant 0 : index
    %56 = vector.load %arg11[%c0_31, %c0_32] : memref<16x64xf32, #tpu.memory_space<vmem>>, vector<16x64xf32>
    %57 = arith.mulf %55, %56 : vector<16x64xf32>
    %58 = arith.truncf %44 : vector<16x64xf32> to vector<16x64xbf16>
    %c0_33 = arith.constant 0 : index
    %c0_34 = arith.constant 0 : index
    %c0_35 = arith.constant 0 : index
    %59 = vector.load %arg12[%c0_33, %c0_34, %c0_35] : memref<1x16x64xbf16, #tpu.memory_space<vmem>>, vector<1x16x64xbf16>
    %60 = vector.shape_cast %59 : vector<1x16x64xbf16> to vector<16x64xbf16>
    %61 = vector.shape_cast %58 : vector<16x64xbf16> to vector<1x16x64xbf16>
    tpu.vector_store %arg12[%c0_33, %c0_34, %c0_35], %61 {strides = array<i32>} : memref<1x16x64xbf16, #tpu.memory_space<vmem>>, vector<1x16x64xbf16>,
    %62 = arith.truncf %57 : vector<16x64xf32> to vector<16x64xbf16>
    %c0_36 = arith.constant 0 : index
    %c0_37 = arith.constant 0 : index
    %c0_38 = arith.constant 0 : index
    %63 = vector.load %arg13[%c0_36, %c0_37, %c0_38] : memref<1x16x64xbf16, #tpu.memory_space<vmem>>, vector<1x16x64xbf16>
    %64 = vector.shape_cast %63 : vector<1x16x64xbf16> to vector<16x64xbf16>
    %65 = vector.shape_cast %62 : vector<16x64xbf16> to vector<1x16x64xbf16>
    tpu.vector_store %arg13[%c0_36, %c0_37, %c0_38], %65 {strides = array<i32>} : memref<1x16x64xbf16, #tpu.memory_space<vmem>>, vector<1x16x64xbf16>,
    %66 = vector.extract_strided_slice %31 {offsets = [0, 128], sizes = [16, 64], strides = [1, 1]} : vector<16x256xf32> to vector<16x64xf32>
    %67 = arith.truncf %66 : vector<16x64xf32> to vector<16x64xbf16>
    %c0_39 = arith.constant 0 : index
    %c0_40 = arith.constant 0 : index
    %c0_41 = arith.constant 0 : index
    %68 = vector.load %arg14[%c0_39, %c0_40, %c0_41] : memref<1x16x64xbf16, #tpu.memory_space<vmem>>, vector<1x16x64xbf16>
    %69 = vector.shape_cast %68 : vector<1x16x64xbf16> to vector<16x64xbf16>
    %70 = vector.shape_cast %67 : vector<16x64xbf16> to vector<1x16x64xbf16>
    tpu.vector_store %arg14[%c0_39, %c0_40, %c0_41], %70 {strides = array<i32>} : memref<1x16x64xbf16, #tpu.memory_space<vmem>>, vector<1x16x64xbf16>,
    %71 = vector.extract_strided_slice %31 {offsets = [0, 192], sizes = [16, 64], strides = [1, 1]} : vector<16x256xf32> to vector<16x64xf32>
    %72 = arith.negf %71 : vector<16x64xf32>
    %73 = math.exp %72 : vector<16x64xf32>
    %cst_42 = arith.constant 1.000000e+00 : f32
    %74 = vector.broadcast %cst_42 : f32 to vector<16x64xf32>
    %75 = arith.addf %74, %73 : vector<16x64xf32>
    %76 = arith.divf %74, %75 : vector<16x64xf32>
    %77 = arith.mulf %71, %76 : vector<16x64xf32>
    %c0_43 = arith.constant 0 : index
    %c0_44 = arith.constant 0 : index
    %c0_45 = arith.constant 0 : index
    %78 = vector.load %arg15[%c0_43, %c0_44, %c0_45] : memref<1x16x64xf32, #tpu.memory_space<vmem>>, vector<1x16x64xf32>
    %79 = vector.shape_cast %78 : vector<1x16x64xf32> to vector<16x64xf32>
    %80 = vector.shape_cast %77 : vector<16x64xf32> to vector<1x16x64xf32>
    tpu.vector_store %arg15[%c0_43, %c0_44, %c0_45], %80 {strides = array<i32>} : memref<1x16x64xf32, #tpu.memory_space<vmem>>, vector<1x16x64xf32>,
    return
  }
  func.func @transform_0(%arg0: i32, %arg1: i32) -> (i32, i32, i32) {
    %c0_i32 = arith.constant 0 : i32
    %c0_i32_0 = arith.constant 0 : i32
    return %arg0, %arg1, %c0_i32 : i32, i32, i32
  }
  func.func @transform_1(%arg0: i32, %arg1: i32) -> (i32, i32) {
    %c0_i32 = arith.constant 0 : i32
    %c0_i32_0 = arith.constant 0 : i32
    %c0_i32_1 = arith.constant 0 : i32
    return %c0_i32, %c0_i32_0 : i32, i32
  }
  func.func @transform_2(%arg0: i32, %arg1: i32) -> (i32, i32) {
    %c0_i32 = arith.constant 0 : i32
    %c0_i32_0 = arith.constant 0 : i32
    %c0_i32_1 = arith.constant 0 : i32
    return %c0_i32, %c0_i32_0 : i32, i32
  }
  func.func @transform_3(%arg0: i32, %arg1: i32) -> (i32, i32) {
    %c0_i32 = arith.constant 0 : i32
    %c0_i32_0 = arith.constant 0 : i32
    %c0_i32_1 = arith.constant 0 : i32
    return %c0_i32, %c0_i32_0 : i32, i32
  }
  func.func @transform_4(%arg0: i32, %arg1: i32) -> (i32, i32) {
    %c0_i32 = arith.constant 0 : i32
    %c0_i32_0 = arith.constant 0 : i32
    %c0_i32_1 = arith.constant 0 : i32
    return %c0_i32, %c0_i32_0 : i32, i32
  }
  func.func @transform_5(%arg0: i32, %arg1: i32) -> (i32, i32) {
    %c0_i32 = arith.constant 0 : i32
    %c0_i32_0 = arith.constant 0 : i32
    return %arg1, %c0_i32 : i32, i32
  }
  func.func @transform_6(%arg0: i32, %arg1: i32) -> (i32, i32) {
    %c0_i32 = arith.constant 0 : i32
    %c0_i32_0 = arith.constant 0 : i32
    return %arg1, %c0_i32 : i32, i32
  }
  func.func @transform_7(%arg0: i32, %arg1: i32) -> (i32, i32) {
    %c0_i32 = arith.constant 0 : i32
    %c0_i32_0 = arith.constant 0 : i32
    return %arg1, %c0_i32 : i32, i32
  }
  func.func @transform_8(%arg0: i32, %arg1: i32) -> (i32, i32) {
    %c0_i32 = arith.constant 0 : i32
    %c0_i32_0 = arith.constant 0 : i32
    return %arg1, %c0_i32 : i32, i32
  }
  func.func @transform_9(%arg0: i32, %arg1: i32) -> (i32, i32) {
    %c0_i32 = arith.constant 0 : i32
    %c0_i32_0 = arith.constant 0 : i32
    return %arg1, %c0_i32 : i32, i32
  }
  func.func @transform_10(%arg0: i32, %arg1: i32) -> (i32, i32, i32) {
    %c0_i32 = arith.constant 0 : i32
    %c0_i32_0 = arith.constant 0 : i32
    return %arg0, %arg1, %c0_i32 : i32, i32, i32
  }
  func.func @transform_11(%arg0: i32, %arg1: i32) -> (i32, i32, i32) {
    %c0_i32 = arith.constant 0 : i32
    %c0_i32_0 = arith.constant 0 : i32
    return %arg0, %arg1, %c0_i32 : i32, i32, i32
  }
  func.func @transform_12(%arg0: i32, %arg1: i32) -> (i32, i32, i32) {
    %c0_i32 = arith.constant 0 : i32
    %c0_i32_0 = arith.constant 0 : i32
    return %arg0, %arg1, %c0_i32 : i32, i32, i32
  }
  func.func @transform_13(%arg0: i32, %arg1: i32) -> (i32, i32, i32) {
    %c0_i32 = arith.constant 0 : i32
    %c0_i32_0 = arith.constant 0 : i32
    return %arg0, %arg1, %c0_i32 : i32, i32, i32
  }
}

</mosaic_0001>

<bundles_post_ra>
// kernel: tpu_custom_call.1
= control target key start
LH: loop header
LB: loop body
LE: loop exit
PB: predicated region body
PF: predicated region fallthrough
CT: control target
= control target key end

     0   :  { %s2944_s0 = inlined_call_operand.hbm [shape: f32[2,32,64], index: 0, kind: input, shape index: {}]   ;;  %s2945_s1 = inlined_call_operand.vmem [shape: f32[1,64], index: 1, kind: input, shape index: {}]   ;;  %s2946_s2 = inlined_call_operand.hbm [shape: f32[1,64], index: 2, kind: input, shape index: {}]   ;;  %s2947_s3 = inlined_call_operand.hbm [shape: bf16[64,256], index: 3, kind: input, shape index: {}]   ;;  %s2948_s4 = inlined_call_operand.vmem [shape: f32[1,256], index: 4, kind: input, shape index: {}]   ;;  %s2949_s5 = inlined_call_operand.hbm [shape: f32[32,64], index: 5, kind: input, shape index: {}]   ;;  %s2950_s6 = inlined_call_operand.hbm [shape: f32[32,64], index: 6, kind: input, shape index: {}]   ;;  %s2951_s7 = inlined_call_operand.hbm [shape: f32[32,64], index: 7, kind: input, shape index: {}]   ;;  %s2952_s8 = inlined_call_operand.hbm [shape: f32[32,64], index: 8, kind: input, shape index: {}]   ;;  %s2953_s9 = inlined_call_operand.hbm [shape: f32[32,64], index: 9, kind: input, shape index: {}]   ;;  %s2954_s10 = inlined_call_operand.hbm [shape: bf16[2,32,64], index: 10, kind: output, shape index: {0}]   ;;  %s2955_s11 = inlined_call_operand.hbm [shape: bf16[2,32,64], index: 11, kind: output, shape index: {1}]   ;;  %s2956_s12 = inlined_call_operand.hbm [shape: bf16[2,32,64], index: 12, kind: output, shape index: {2}]   ;;  %s2957_s13 = inlined_call_operand.hbm [shape: f32[2,32,64], index: 13, kind: output, shape index: {3}]  }
   0x1   :  { %2996 = sst [smem:[#allocation44_spill]] %s2944_s0 }
   0x2   :  { %2997 = sst [smem:[#allocation45_spill]] %s2945_s1 }
   0x3   :  { %2998 = sst [smem:[#allocation46_spill]] %s2946_s2 }
   0x4   :  { %2999 = sst [smem:[#allocation47_spill]] %s2947_s3 }
   0x5   :  { %3000 = sst [smem:[#allocation48_spill]] %s2948_s4 }
   0x6   :  { %3001 = sst [smem:[#allocation49_spill]] %s2949_s5 }
   0x7   :  { %3002 = sst [smem:[#allocation50_spill]] %s2950_s6 }
   0x8   :  { %3003 = sst [smem:[#allocation51_spill]] %s2951_s7 }
   0x9   :  { %3004 = sst [smem:[#allocation52_spill]] %s2952_s8 }
   0xa   :  { %3005 = sst [smem:[#allocation53_spill]] %s2953_s9 }
   0xb   :  { %3006 = sst [smem:[#allocation54_spill]] %s2954_s10 }
   0xc   :  { %3007 = sst [smem:[#allocation55_spill]] %s2955_s11 }
   0xd   :  { %3008 = sst [smem:[#allocation56_spill]] %s2956_s12 }
   0xe   :  { %3009 = sst [smem:[#allocation57_spill]] %s2957_s13 }
   0xf   :  { %19 = vsyncpa [#allocation3], 0 }
  0x10   :  { %21 = vsyncpa [#allocation3 + $0x1], 0 }
  0x11   :  { %22 = vsyncpa [#allocation6], 0 }
  0x12   :  { %23 = vsyncpa [#allocation9], 0 }
  0x13   :  { %25 = vsyncpa [#allocation9 + $0x1], 0 }
  0x14   :  { %26 = vsyncpa [#allocation12], 0 }
  0x15   :  { %28 = vsyncpa [#allocation12 + $0x1], 0 }
  0x16   :  { %29 = vsyncpa [#allocation15], 0 }
  0x17   :  { %31 = vsyncpa [#allocation15 + $0x1], 0 }
  0x18   :  { %32 = vsyncpa [#allocation4], 0 }
  0x19   :  { %34 = vsyncpa [#allocation4 + $0x1], 0 }
  0x1a   :  { %35 = vsyncpa [#allocation18], 0 }
  0x1b   :  { %37 = vsyncpa [#allocation18 + $0x1], 0 }
  0x1c   :  { %38 = vsyncpa [#allocation21], 0 }
  0x1d   :  { %40 = vsyncpa [#allocation21 + $0x1], 0  ;;  %s2314_s25 = smov 0   ;;  %s2316_s26 = smov 0  }
  0x1e   :  { %s2318_s27 = smov 0   ;;  %s2320_s28 = smov 0  }
  0x1f   :  { %s2322_s29 = smov 0   ;;  %s2324_s30 = smov 0  }
  0x20   :  { %s2326_s14 = smov 0   ;;  %s2328_s15 = smov 0  }
  0x21   :  { %s2330_s16 = smov 0   ;;  %s2332_s17 = smov 0  }
  0x22   :  { %s2334_s18 = smov 0  }
  0x23 LB: > { %3010 = sst [smem:[#allocation30_spill]] %s2183_s26  ;;  %s2368_s19 = sadd.s32 4294967295, %s2219_s18   ;;  %s2219_s18 = sphi %s2334_s18, %s46_s18   ;;  %s2215_s17 = sphi %s2332_s17, %s3093_s17   ;;  %s2211_s16 = sphi %s2330_s16, %s3092_s16   ;;  %s2207_s15 = sphi %s2328_s15, %s3091_s15   ;;  %s2203_s14 = sphi %s2326_s14, %s3090_s14   ;;  %s2199_s30 = sphi %s2324_s30, %s3089_s30   ;;  %s2195_s29 = sphi %s2322_s29, %s3088_s29   ;;  %s2191_s28 = sphi %s2320_s28, %s3083_s28   ;;  %s2187_s27 = sphi %s2318_s27, %s3087_s27   ;;  %s2183_s26 = sphi %s2316_s26, %s3086_s26   ;;  %s2179_s25 = sphi %s2314_s25, %s3081_s25  }
  0x24   : > { %3011 = sst [smem:[#allocation31_spill]] %s2191_s28  ;;  %s2961_s20 = sadd.s32 4294967294, %s2219_s18  }
  0x25   : > { %3012 = sst [smem:[#allocation32_spill]] %s2195_s29  ;;  %p2964_p0 = scmp.eq.s32.totalorder %s2219_s18, 0 }
  0x26   : > { %3013 = sst [smem:[#allocation33_spill]] %s2203_s14  ;;  %p80_p1 = scmp.ne.s32.totalorder %s2195_s29, %s2191_s28 }
  0x27   : > { %3014 = sst [smem:[#allocation34_spill]] %s2207_s15  ;;  %p2965_p2 = scmp.eq.s32.totalorder %s2368_s19, 0 }
  0x28   : > { %3015 = sst [smem:[#allocation35_spill]] %s2368_s19  ;;  %p184_p3 = scmp.ne.s32.totalorder %s2187_s27, %s2183_s26 }
  0x29   : > { %p190_p4 = scmp.ne.s32.totalorder %s2183_s26, %s2179_s25  ;;  %p2381_p5 = por %p2965_p2, %p80_p1 }
  0x2a   : > { %p2388_p7 = por %p184_p3, %p2964_p0  ;;  %p326_p9 = scmp.eq.s32.totalorder %s2961_s20, 3 }
  0x2b   : > { %s3016_s22 = scalar_select %p2381_p5, 1, 0 }
  0x2c   : > { %p2394_p8 = por %p190_p4, %p2965_p2  ;;  %p1495_p10 = scmp.ge.s32.totalorder %s2219_s18, 1 }
  0x2d   : > { %3017 = sst [smem:[#allocation36_spill]] %s3016_s22  ;;  %p417_p11 = scmp.lt.s32.totalorder %s2219_s18, 5 }
  0x2e   : > { %s3019_s24 = scalar_select %p2394_p8, 1, 0 }
  0x2f   : > { %p2402_p12 = por %p326_p9, %p80_p1  ;;  %p2406_p13 = pnand %p1495_p10, %p417_p11 }
  0x30   : > { %3020 = sst [smem:[#allocation37_spill]] %s3019_s24  ;;  %s2221_s28 = smov [#allocation5]  }
  0x31   : > { %s3021_s25 = scalar_select %p2402_p12, 1, 0 }
  0x32   : > { %s3023_s21 = scalar_select %p2406_p13, 1, 0 }
  0x33   : > { %3022 = sst [smem:[#allocation38_spill]] %s3021_s25  ;;  %s433_s13 = sshll.u32 %s2221_s28, 4  ;;  %s434_s13 = int_to_ptr.vmem [resolvable:$true] %s433_s13 }
  0x34   : > { %3024 = sst [smem:[#allocation39_spill]] %s3023_s21  ;;  %p1607_p3 = pneg %p2406_p13 }
  0x35   : > { %p2968_p1 = scmp.lt.s32.totalorder %s2219_s18, 4  ;;  %s1788_s11 = scalar_lea.vmem %s434_s13, 16 }
  0x36   : > { %p2414_p4 = pnand %p1607_p3, %p2965_p2  ;;  %p1789_p10 = scmp.ne.s32.totalorder %s434_s13, %s1788_s11 }
  0x37   : > { %s1795_s28 = scalar_lea.vmem %s434_s13, 32  ;;  %p1796_p0 = scmp.lt.s32.totalorder %s434_s13, %s434_s13 }
  0x38   : > { %p1779_p9 = pneg %p2414_p4  ;;  %p1797_p12 = scmp.lt.s32.totalorder %s1795_s28, %s1788_s11 }
  0x3a   : > { %p1791_p11 = pnand %p1789_p10, %p1779_p9  ;;  %p1798_p3 = por %p1797_p12, %p1796_p0 }
  0x3c   : > { %p1792_p6 = pneg %p1791_p11 }
  0x3e   : > { %p1799_p2 = pnand %p1798_p3, %p1792_p6 }
  0x40   : > { %1802 = shalt.err (!%p1799_p2)
}
  0x41   : > { %s3026_s2 = sld [smem:[#allocation46_spill]]  ;;  %s2967_s25 = sand.u32 1, %s2187_s27  }
  0x42   : > { %s2434_s15 = sshll.u32 %s2967_s25, 4  ;;  %s2437_s11 = sshll.u32 %s2211_s16, 8 }
  0x43   : > { %s3027_s5 = sld [smem:[#allocation49_spill]]  ;;  %s487_s10 = scalar_lea.vmem [#allocation8], %s2434_s15 }
  0x44   : > { %s494_s20 = sshll.u32 %s487_s10, 4  ;;  %p2448_p0 = pnand %p2968_p1, %p2388_p7  ;;  %s495_s20 = int_to_ptr.vmem [resolvable:$true] %s494_s20 }
  0x45   : > { %s1816_s14 = scalar_lea.vmem %s495_s20, 256  ;;  %s2222_s23 = smov [#allocation8]  }
  0x46   : > { %p2458_p2 = pneg %p2448_p0  ;;  %p1817_p6 = scmp.ne.s32.totalorder %s495_s20, %s1816_s14 }
  0x47   : > { %1610 = dma.hbm_to_vmem [thread:$0]  (!%p2414_p4), %s3026_s2, 16, %s434_s13, [#allocation6]  }
  0x48   : > { %s3029_s13 = sand.u32 1, %s2219_s18   ;;  %p1819_p12 = pnand %p1817_p6, %p2458_p2 }
  0x49   : > { %s493_s4 = scalar_lea.hbm %s3027_s5, %s2437_s11  ;;  %s2454_s25 = scalar_lea.sflag [#allocation9], %s3029_s13 }
  0x4a   : > { %p1820_p10 = pneg %p1819_p12  ;;  %s1821_s28 = sshll.u32 %s2222_s23, 4  ;;  %s1822_s28 = int_to_ptr.vmem [resolvable:$false] %s1821_s28 }
  0x4b   : > { %s1823_s10 = scalar_lea.vmem %s1822_s28, 512  ;;  %p1824_p7 = scmp.lt.s32.totalorder %s495_s20, %s1822_s28 }
  0x4c   : > { %p1825_p11 = scmp.lt.s32.totalorder %s1823_s10, %s1816_s14 }
  0x4e   : > { %p1826_p3 = por %p1825_p11, %p1824_p7 }
  0x50   : > { %p1827_p1 = pnand %p1826_p3, %p1820_p10 }
  0x52   : > { %1830 = shalt.err (!%p1827_p1)
}
  0x53   : > { %s2977_s13 = smov 128   ;;  %s2979_s5 = smov 8  }
  0x54   : > { %1620 = dma.hbm_to_vmem [thread:$0]  (!%p2448_p0), %s493_s4, 256, %s495_s20, %s2454_s25, %s2977_s13, %s2977_s13, %s2979_s5  }
  0x55   : > { %s3031_s7 = sld [smem:[#allocation51_spill]]  ;;  %s529_s28 = scalar_lea.vmem [#allocation11], %s2434_s15 }
  0x56   : > { %s536_s10 = sshll.u32 %s529_s28, 4  ;;  %s3032_s26 = sand.u32 1, %s2219_s18   ;;  %s537_s10 = int_to_ptr.vmem [resolvable:$true] %s536_s10 }
  0x57   : > { %s2477_s22 = scalar_lea.sflag [#allocation12], %s3032_s26  ;;  %s1844_s21 = scalar_lea.vmem %s537_s10, 256 }
  0x58   : > { %3033 = sst [smem:[#allocation40_spill]] %s2477_s22  ;;  %p1845_p1 = scmp.ne.s32.totalorder %s537_s10, %s1844_s21 }
  0x59   : > { %s2225_s9 = smov [#allocation11]  }
  0x5a   : > { %p1847_p6 = pnand %p1845_p1, %p2458_p2  ;;  %s1849_s8 = sshll.u32 %s2225_s9, 4  ;;  %s1850_s8 = int_to_ptr.vmem [resolvable:$false] %s1849_s8 }
  0x5b   : > { %s535_s14 = scalar_lea.hbm %s3031_s7, %s2437_s11  ;;  %s1851_s6 = scalar_lea.vmem %s1850_s8, 512 }
  0x5c   : > { %p1848_p12 = pneg %p1847_p6  ;;  %p1852_p10 = scmp.lt.s32.totalorder %s537_s10, %s1850_s8 }
  0x5d   : > { %p1853_p7 = scmp.lt.s32.totalorder %s1851_s6, %s1844_s21 }
  0x5f   : > { %p1854_p11 = por %p1853_p7, %p1852_p10 }
  0x61   : > { %p1855_p3 = pnand %p1854_p11, %p1848_p12 }
  0x63   : > { %1858 = shalt.err (!%p1855_p3)
}
  0x64   : > { %1626 = dma.hbm_to_vmem [thread:$0]  (!%p2448_p0), %s535_s14, 256, %s537_s10, %s2477_s22, %s2977_s13, %s2977_s13, %s2979_s5  }
  0x65   : > { %s2226_s4 = smov [#allocation7]  }
  0x66   : > { %s443_s26 = sshll.u32 %s2226_s4, 4  ;;  %s444_s26 = int_to_ptr.vmem [resolvable:$true] %s443_s26 }
  0x67   : > { %s1870_s24 = scalar_lea.vmem %s444_s26, 1024  ;;  %p1878_p10 = scmp.lt.s32.totalorder %s444_s26, %s444_s26 }
  0x68   : > { %p1871_p1 = scmp.ne.s32.totalorder %s444_s26, %s1870_s24  ;;  %p1879_p12 = scmp.lt.s32.totalorder %s1870_s24, %s1870_s24 }
  0x6a   : > { %p1873_p6 = pnand %p1871_p1, %p1779_p9  ;;  %p1880_p7 = por %p1879_p12, %p1878_p10 }
  0x6c   : > { %p1874_p8 = pneg %p1873_p6 }
  0x6e   : > { %p1881_p11 = pnand %p1880_p7, %p1874_p8 }
  0x70   : > { %1884 = shalt.err (!%p1881_p11)
}
  0x71   : > { %s3034_s3 = sld [smem:[#allocation47_spill]]  ;;  %s3035_s9 = sadd.s32 1, %s2211_s16 }
  0x72   : > { %p56_p8 = scmp.ge.s32.totalorder %s3035_s9, 2  ;;  %s58_s12 = sadd.s32 1, %s2215_s17 }
  0x73   : > { %s67_s21 = sadd.s32 1, %s2199_s30  ;;  %p74_p9 = scmp.ne.s32.totalorder %s2199_s30, %s2195_s29 }
  0x74   : > { %s3036_s20 = smov %s3035_s9  ;;  %s3097_s12 = smov (!%p56_p8, %s58_s12), %s2215_s17 }
  0x75   : > { %s3095_s20 = smov (%p56_p8, %s3036_s20), 0  ;;  %p3038_p3 = scmp.eq.s32.totalorder %s2219_s18, 0 }
  0x76   : > { %3037 = sst [smem:[#allocation41_spill]] %s3095_s20  ;;  %s63_s23 = ssub.s32 %s2211_s16, %s3095_s20 }
  0x77   : > { %1613 = dma.hbm_to_vmem [thread:$0]  (!%p2414_p4), %s3034_s3, 1024, %s444_s26, [#allocation6], %s2977_s13, %s2977_s13, %s2979_s5  }
  0x78   : > { %p2513_p1 = por %p3038_p3, %p74_p9  ;;  %p60_p4 = scmp.ge.s32.totalorder %s3097_s12, 2 }
  0x79   : > { %p175_p6 = scmp.eq.s32.totalorder %s63_s23, 0  ;;  %p3040_p10 = scmp.eq.s32.totalorder %s2368_s19, 3 }
  0x7a   : > { %s460_s10 = sand.u32 1, %s2199_s30   ;;  %s3099_s12 = smov (%p60_p4, %s3097_s12), 0 }
  0x7b   : > { %p2519_p12 = por %p3040_p10, %p74_p9  ;;  %3043 = sst [smem:[#allocation43_spill]] %s3099_s12 }
  0x7c   : > { %s3044_s4 = sadd.s32 1, %s2187_s27  ;;  %s62_s24 = ssub.s32 %s2215_s17, %s3099_s12 }
  0x7d   : > { %s3041_s28 = scalar_select %p2519_p12, 1, 0 }
  0x7e   : > { %s2529_s26 = scalar_select %p175_p6, %s2187_s27, %s3044_s4  }
  0x7f   : > { %3042 = sst [smem:[#allocation42_spill]] %s3041_s28  ;;  %s64_s6 = sor.u32 %s63_s23, %s62_s24 }
  0x80   : > { %s1499_s8 = sshll.u32 %s460_s10, 4  ;;  %p65_p7 = scmp.eq.s32.totalorder %s64_s6, 0 }
  0x81   : > { %s1500_s9 = sshll.u32 %s2211_s16, 1  ;;  %s1501_s13 = sshll.u32 %s2215_s17, 2 }
  0x82   : > { %s2536_s5 = scalar_select %p65_p7, %s2199_s30, %s67_s21  }
  0x83   : > { %s470_s3 = sadd.s32 %s1501_s13, %s1500_s9  ;;  %s464_s7 = scalar_lea.vmem [#allocation2], %s1499_s8 }
  0x84   : > { %s473_s20 = sshll.u32 %s464_s7, 4  ;;  %s1502_s28 = sshll.u32 %s470_s3, 7  ;;  %s474_s20 = int_to_ptr.vmem [resolvable:$true] %s473_s20 }
  0x85   : > { %s3045_s0 = sld [smem:[#allocation44_spill]]  ;;  %p3046_p11 = scmp.lt.s32.totalorder %s2219_s18, 4 }
  0x86   : > { %s3048_s6 = sld [smem:[#allocation50_spill]]  ;;  %s508_s13 = scalar_lea.vmem [#allocation10], %s2434_s15 }
  0x87   : > { %p2545_p8 = pnand %p3046_p11, %p2513_p1  ;;  %s515_s8 = sshll.u32 %s508_s13, 4  ;;  %s516_s8 = int_to_ptr.vmem [resolvable:$true] %s515_s8 }
  0x88   : > { %s461_s7 = scalar_lea.sflag [#allocation3], %s460_s10  ;;  %s1898_s3 = scalar_lea.vmem %s474_s20, 256 }
  0x89   : > { %p1887_p9 = pneg %p2545_p8  ;;  %p1899_p3 = scmp.ne.s32.totalorder %s474_s20, %s1898_s3 }
  0x8a   : > { %s2227_s29 = smov [#allocation2]  }
  0x8b   : > { %s472_s22 = scalar_lea.hbm %s3045_s0, %s1502_s28  ;;  %p1901_p4 = pnand %p1899_p3, %p1887_p9 }
  0x8c   : > { %s514_s21 = scalar_lea.hbm %s3048_s6, %s2437_s11  ;;  %s1903_s19 = sshll.u32 %s2227_s29, 4  ;;  %s1904_s19 = int_to_ptr.vmem [resolvable:$false] %s1903_s19 }
  0x8d   : > { %p1902_p6 = pneg %p1901_p4  ;;  %s1905_s14 = scalar_lea.vmem %s1904_s19, 512 }
  0x8e   : > { %p1906_p1 = scmp.lt.s32.totalorder %s474_s20, %s1904_s19  ;;  %p1907_p10 = scmp.lt.s32.totalorder %s1905_s14, %s1898_s3 }
  0x90   : > { %p1908_p7 = por %p1907_p10, %p1906_p1 }
  0x92   : > { %p1909_p11 = pnand %p1908_p7, %p1902_p6 }
  0x94   : > { %1912 = shalt.err (!%p1909_p11)
}
  0x95   : > { %s3049_s28 = smov 8   ;;  %s3050_s9 = smov 128  }
  0x96   : > { %1617 = dma.hbm_to_vmem [thread:$0]  (!%p2545_p8), %s472_s22, 256, %s474_s20, %s461_s7, %s3050_s9, %s3050_s9, %s3049_s28  }
  0x97   : > { %s1926_s10 = scalar_lea.vmem %s516_s8, 256  ;;  %s2228_s23 = smov [#allocation10]  }
  0x98   : > { %p1927_p9 = scmp.ne.s32.totalorder %s516_s8, %s1926_s10  ;;  %s1931_s24 = sshll.u32 %s2228_s23, 4  ;;  %s1932_s24 = int_to_ptr.vmem [resolvable:$false] %s1931_s24 }
  0x99   : > { %s1933_s13 = scalar_lea.vmem %s1932_s24, 512  ;;  %p1934_p1 = scmp.lt.s32.totalorder %s516_s8, %s1932_s24 }
  0x9a   : > { %p1929_p3 = pnand %p1927_p9, %p2458_p2  ;;  %p1935_p6 = scmp.lt.s32.totalorder %s1933_s13, %s1926_s10 }
  0x9c   : > { %p1930_p4 = pneg %p1929_p3  ;;  %p1936_p10 = por %p1935_p6, %p1934_p1 }
  0x9e   : > { %p1937_p7 = pnand %p1936_p10, %p1930_p4 }
  0xa0   : > { %1940 = shalt.err (!%p1937_p7)
}
  0xa1   : > { %1623 = dma.hbm_to_vmem [thread:$0]  (!%p2448_p0), %s514_s21, 256, %s516_s8, %s2454_s25, %s3050_s9, %s3050_s9, %s3049_s28  }
  0xa2   : > { %s3051_s3 = sld [smem:[#allocation52_spill]]  ;;  %s550_s19 = scalar_lea.vmem [#allocation13], %s2434_s15 }
  0xa3   : > { %s557_s14 = sshll.u32 %s550_s19, 4  ;;  %s2229_s23 = smov [#allocation13]   ;;  %s558_s14 = int_to_ptr.vmem [resolvable:$true] %s557_s14 }
  0xa4   : > { %s1954_s10 = scalar_lea.vmem %s558_s14, 256  ;;  %s1959_s24 = sshll.u32 %s2229_s23, 4  ;;  %s1960_s24 = int_to_ptr.vmem [resolvable:$false] %s1959_s24 }
  0xa5   : > { %p1955_p8 = scmp.ne.s32.totalorder %s558_s14, %s1954_s10  ;;  %s1961_s13 = scalar_lea.vmem %s1960_s24, 512 }
  0xa6   : > { %p1962_p3 = scmp.lt.s32.totalorder %s558_s14, %s1960_s24  ;;  %p1963_p4 = scmp.lt.s32.totalorder %s1961_s13, %s1954_s10 }
  0xa7   : > { %p1957_p11 = pnand %p1955_p8, %p2458_p2 }
  0xa8   : > { %s556_s29 = scalar_lea.hbm %s3051_s3, %s2437_s11  ;;  %p1964_p1 = por %p1963_p4, %p1962_p3 }
  0xa9   : > { %p1958_p9 = pneg %p1957_p11 }
  0xab   : > { %p1965_p6 = pnand %p1964_p1, %p1958_p9 }
  0xad   : > { %1968 = shalt.err (!%p1965_p6)
}
  0xae   : > { %s3052_s25 = sld [smem:[#allocation40_spill]]  ;;  %s571_s4 = scalar_lea.vmem [#allocation14], %s2434_s15 }
  0xaf   : > { %s3053_s22 = sld [smem:[#allocation53_spill]]  ;;  %s578_s7 = sshll.u32 %s571_s4, 4  ;;  %s579_s7 = int_to_ptr.vmem [resolvable:$true] %s578_s7 }
  0xb0   : > { %s3054_s3 = sand.u32 1, %s2187_s27   ;;  %s1982_s10 = scalar_lea.vmem %s579_s7, 256 }
  0xb1   : > { %s568_s19 = scalar_lea.sflag [#allocation15], %s3054_s3  ;;  %p1983_p10 = scmp.ne.s32.totalorder %s579_s7, %s1982_s10 }
  0xb2   : > { %s2230_s23 = smov [#allocation14]  }
  0xb3   : > { %p1985_p7 = pnand %p1983_p10, %p2458_p2  ;;  %s1987_s24 = sshll.u32 %s2230_s23, 4  ;;  %s1988_s24 = int_to_ptr.vmem [resolvable:$false] %s1987_s24 }
  0xb4   : > { %1629 = dma.hbm_to_vmem [thread:$0]  (!%p2448_p0), %s556_s29, 256, %s558_s14, %s3052_s25, %s3050_s9, %s3050_s9, %s3049_s28  }
  0xb5   : > { %s577_s20 = scalar_lea.hbm %s3053_s22, %s2437_s11  ;;  %p1986_p8 = pneg %p1985_p7 }
  0xb6   : > { %s1989_s13 = scalar_lea.vmem %s1988_s24, 512  ;;  %p1990_p11 = scmp.lt.s32.totalorder %s579_s7, %s1988_s24 }
  0xb7   : > { %p1991_p9 = scmp.lt.s32.totalorder %s1989_s13, %s1982_s10 }
  0xb9   : > { %p1992_p3 = por %p1991_p9, %p1990_p11 }
  0xbb   : > { %p1993_p4 = pnand %p1992_p3, %p1986_p8 }
  0xbd   : > { %1996 = shalt.err (!%p1993_p4)
}
  0xbe   : > { %1632 = dma.hbm_to_vmem [thread:$0]  (!%p2448_p0), %s577_s20, 256, %s579_s7, %s568_s19, %s3050_s9, %s3050_s9, %s3049_s28  }
  0xbf   : > { %590 = sbr.rel (%p2406_p13) target bundleno = 1390 (0x56e), region = 60  ;;  %s3056_s2 = sld [smem:[#allocation32_spill]] (!%p2406_p13) }
  0xc5   : > { %s2604_s29 = sand.u32 1, %s3056_s2  }
  0xc6   : > { %s2988_s14 = sshll.u32 %s2604_s29, 4  ;;  %s593_s25 = scalar_lea.sflag [#allocation3], %s2604_s29 }
  0xc7   : > { %s596_s21 = scalar_lea.vmem [#allocation2], %s2988_s14 }
  0xc8   : > { %2146 = dma.done.wait (%p2381_p5), %s593_s25, 256  }
  0xc9   : > { %2148 = vsyncadd (%p2381_p5), %s593_s25, 4294967040  ;;  %s3058_s1 = sld [smem:[#allocation35_spill]] }
  0xcf   : > { %p3059_p0 = scmp.eq.s32.totalorder %s3058_s1, 0 }
  0xd1   : > { %2150 = dma.done.wait (%p3059_p0), [#allocation6], 1040   ;;  %p3060_p13 = pmov %p3059_p0 }
  0xd2   : > { %s3061_s28 = sld [smem:[#allocation30_spill]]  ;;  %s2619_s8 = sand.u32 1, %s3058_s1  }
  0xd3   : > { %2152 = vsyncadd (%p3060_p13), [#allocation6], 4294966256  ;;  %s3062_s9 = sld [smem:[#allocation37_spill]]  ;;  %s610_s4 = scalar_lea.sflag [#allocation9], %s2619_s8 }
  0xd8   : > { %s611_s22 = sand.u32 1, %s3061_s28  }
  0xd9   : > { %s2622_s20 = sshll.u32 %s611_s22, 4  ;;  %p3063_p2 = scmp.ne.s32.totalorder %s3062_s9, 0 }
  0xda   : > { %s613_s7 = scalar_lea.vmem [#allocation8], %s2622_s20 }
  0xdb   : > { %2154 = dma.done.wait (%p3063_p2), %s610_s4, 512  }
  0xdc   : > { %2156 = vsyncadd (%p3063_p2), %s610_s4, 4294966784  ;;  %s622_s3 = scalar_lea.vmem [#allocation10], %s2622_s20  ;;  %s628_s19 = scalar_lea.sflag [#allocation12], %s2619_s8 }
  0xdd   : > { %s631_s10 = scalar_lea.vmem [#allocation11], %s2622_s20 }
  0xde   : > { %2158 = dma.done.wait (%p3063_p2), %s628_s19, 512  }
  0xdf   : > { %2160 = vsyncadd (%p3063_p2), %s628_s19, 4294966784  ;;  %s640_s23 = scalar_lea.vmem [#allocation13], %s2622_s20  ;;  %s646_s24 = scalar_lea.sflag [#allocation15], %s611_s22 }
  0xe0   : > { %s649_s13 = scalar_lea.vmem [#allocation14], %s2622_s20 }
  0xe1   : > { %2162 = dma.done.wait (%p3063_p2), %s646_s24, 256  }
  0xe2   : > { %2164 = vsyncadd (%p3063_p2), %s646_s24, 4294967040  ;;  %vm747_vm0 = vcmask 523264   ;;  %v743_v0 = vld [vmem:[%s596_s21] sm:$0xff]  ;;  %v744_v1 = vld [vmem:[%s596_s21 + $0x8] sm:$0xff]  ;;  %v2231_v18 = vmov 0   ;;  %s3064_s11 = sld [smem:[#allocation45_spill]]  ;;  %v802_v40 = vlaneseq }
  0xe3   : > { %v748_v2 = vsel %vm747_vm0, %v743_v0, 0.0  ;;  %v751_v3 = vsel %vm747_vm0, %v744_v1, 0.0  ;;  %v1753_v14 = vld [vmem:[#allocation7 + $0x34] ss:$8 sps:$4 sm:$0xff]   ;;  %v1755_v15 = vld [vmem:[#allocation7 + $0x30] ss:$8 sps:$4 sm:$0xff]   ;;  %887 = vmatprep.mubr.bf16.mxu0 %v2231_v18 }
  0xe4   : > { %749 = vadd.xlane.f32.xlu0 %v748_v2  ;;  %v1756_v16 = vld [vmem:[#allocation7 + $0x24] ss:$8 sps:$4 sm:$0xff]   ;;  %863 = vmatprep.subr.bf16.mxu0 %v1753_v14  ;;  %v1758_v17 = vld [vmem:[#allocation7 + $0x20] ss:$8 sps:$4 sm:$0xff]   ;;  %v1759_v19 = vld [vmem:[#allocation7 + $0x14] ss:$8 sps:$4 sm:$0xff]  }
  0xe5   : > { %864 = vmatpush1.bf16.msra.mxu0 %v1755_v15  ;;  %v1761_v20 = vld [vmem:[#allocation7 + $0x10] ss:$8 sps:$4 sm:$0xff]   ;;  %v1762_v21 = vld [vmem:[#allocation7 + $0x4] ss:$8 sps:$4 sm:$0xff]   ;;  %v1764_v22 = vld [vmem:[#allocation7] ss:$8 sps:$4 sm:$0xff]  }
  0xe6   : > { %865 = vmatprep.subr.bf16.mxu0 %v1756_v16  ;;  %v1532_v35 = vld [vmem:[#allocation5] ss:$0 sm:$0xff]  ;;  %v803_v41 = vshrl.u32 %v802_v40, 7  ;;  %s3065_s1 = sld [smem:[#allocation48_spill]]  ;;  %s2657_s28 = sshll.u32 %s2604_s29, 3  ;;  %vm1037_vm1 = vcmask 519168  }
  0xe7   : > { %s2989_s9 = smov 64   ;;  %s2674_s22 = scalar_lea.vmem [#allocation19], %s2657_s28  ;;  %v900_v56 = vld [vmem:[%s622_s3] sm:$0xff]  ;;  %v901_v60 = vld [vmem:[%s622_s3 + $0x8] sm:$0xff]  ;;  %vm904_vm2 = vcmask 1048064  }
  0xe8   : > { %752 = vadd.xlane.f32.xlu0 %v751_v3  ;;  %v1531_v31 = vld [vmem:[%s3064_s11] ss:$0 sm:$0xff]  ;;  %v804_v42 = vsub.s32 0, %v803_v41  ;;  %v808_v44 = vsub.s32 1, %v803_v41  ;;  %s2233_s4 = smov 1   ;;  %v902_v63 = vld [vmem:[%s631_s10] sm:$0xff] }
  0xe9   : > { %866 = vmatpush1.bf16.msra.mxu0 %v1758_v17  ;;  %s2234_s19 = smov 63   ;;  %v903_v3 = vld [vmem:[%s631_s10 + $0x8] sm:$0xff]  ;;  %s2236_s3 = smov 65  }
  0xea   : > { %867 = vmatprep.subr.bf16.mxu0 %v1759_v19  ;;  %s3066_s10 = sld [smem:[#allocation33_spill]]  ;;  %s710_s25 = scalar_lea.vmem [#allocation16], %s2657_s28 }
  0xeb   : > { %s3067_s24 = sld [smem:[#allocation34_spill]]  ;;  %s1119_s21 = sshll.u32 %s710_s25, 4  ;;  %s2759_s21 = int_to_ptr.vmem [resolvable:$true] %s1119_s21 }
  0xec   : > { %v800_v43 = vld [vmem:[%s3065_s1] sm:$0x3] }
  0xed   : > { %868 = vmatpush1.bf16.msra.mxu0 %v1761_v20  ;;  %v805_v45 = vrot.slane %v800_v43, %v804_v42  ;;  %v809_v46 = vrot.slane %v800_v43, %v808_v44 }
  0xee   : > { %869 = vmatprep.subr.bf16.mxu0 %v1762_v21 }
  0xf1   : > { %870 = vmatpush1.bf16.msra.mxu0 %v1764_v22  ;;  %v1017_v22 = vld [vmem:[%s649_s13] sm:$0xff]  ;;  %s1555_s15 = sshll.u32 %s3067_s24, 2 }
 0x16d   : > { %v750_v4 = vpop.xlane.xlu0 %749 }
 0x16e   : > { %v755_v5 = vmul.f32 0.015625, %v750_v4 }
 0x170   : > { %v757_v6 = vsub.f32 %v743_v0, %v755_v5 }
 0x171   : > { %v753_v7 = vpop.xlane.xlu0 %752 }
 0x172   : > { %v756_v8 = vmul.f32 0.015625, %v753_v7  ;;  %v759_v9 = vmul.f32 %v757_v6, %v757_v6 }
 0x174   : > { %v758_v10 = vsub.f32 %v744_v1, %v756_v8  ;;  %v761_v11 = vsel %vm747_vm0, %v759_v9, 0.0  ;;  %v2714_v8 = vld [vmem:[%s613_s7 + $0x8] sm:$0xff] }
 0x175   : > { %762 = vadd.xlane.f32.xlu1 %v761_v11 }
 0x176   : > { %v760_v12 = vmul.f32 %v758_v10, %v758_v10 }
 0x178   : > { %v764_v13 = vsel %vm747_vm0, %v760_v12, 0.0 }
 0x179   : > { %765 = vadd.xlane.f32.xlu1 %v764_v13 }
 0x1fe   : > { %v763_v23 = vpop.xlane.xlu1 %762 }
 0x1ff   : > { %v767_v24 = vmul.f32 0.015625, %v763_v23 }
 0x201   : > { %v769_v25 = vadd.f32 1e-06, %v767_v24 }
 0x202   : > { %v766_v26 = vpop.xlane.xlu1 %765 }
 0x203   : > { %1765 = vrsqrt.f32 %v769_v25  ;;  %v768_v27 = vmul.f32 0.015625, %v766_v26  ;;  %v1018_v25 = vld [vmem:[%s649_s13 + $0x8] sm:$0xff]  ;;  %s1554_s13 = sshll.u32 %s3066_s10, 1  ;;  %s2237_s10 = smov [#allocation16]  }
 0x204   : > { %s2749_s2 = sadd.s32 %s1555_s15, %s1554_s13  ;;  %s2001_s24 = sshll.u32 %s2237_s10, 4  ;;  %s2002_s24 = int_to_ptr.vmem [resolvable:$false] %s2001_s24 }
 0x205   : > { %v770_v28 = vadd.f32 1e-06, %v768_v27  ;;  %s2756_s1 = sshll.u32 %s2749_s2, 6  ;;  %s2003_s13 = scalar_lea.vmem %s2002_s24, 256 }
 0x206   : > { %p2004_p10 = scmp.lt.s32.totalorder %s2759_s21, %s2002_s24 }
 0x207   : > { %1767 = vrsqrt.f32 %v770_v28 }
 0x210   : > { %v1766_v29 = vpop.eup %1765 }
 0x211   : > { %v773_v30 = vmul.f32 %v1766_v29, %v757_v6  ;;  %v2705_v6 = vld [vmem:[%s613_s7] sm:$0xff]  ;;  %s2235_s7 = smov 127  }
 0x213   : > { %v781_v34 = vmul.f32 %v1531_v31, %v773_v30 }
 0x214   : > { %v1768_v32 = vpop.eup %1767 }
 0x215   : > { %v774_v33 = vmul.f32 %v1768_v32, %v758_v10  ;;  %v789_v37 = vadd.f32 %v1532_v35, %v781_v34 }
 0x217   : > { %v782_v36 = vmul.f32 %v1531_v31, %v774_v33 }
 0x219   : > { %v790_v38 = vadd.f32 %v1532_v35, %v782_v36 }
 0x21b   : > { %v799_v39 = vpack.c.bf16 %v790_v38, %v789_v37 }
 0x21d   : > { %1541 = vmatmul.mubr.msk.bf16.vlgmr.msra.gmra.mxu0 %vm747_vm0, %v799_v39 }
 0x2dd   : > { %v889_v47 = vpop.f32.mrf.mxu0 }
 0x2de   : > { %v2654_v48 = vadd.f32 %v889_v47, %v805_v45 }
 0x2df   : > { %v891_v49 = vpop.f32.mrf.mxu0 }
 0x2e0   : > { %v2659_v50 = vadd.f32 %v891_v49, %v809_v46  ;;  %965 = vrot.lane.b32.xlu0 %v2654_v48, %s2989_s9 }
 0x2e1   : > { %v893_v51 = vpop.f32.mrf.mxu0 }
 0x2e2   : > { %v1577_v52 = vpack.c.bf16 %v2659_v50, %v2659_v50  ;;  %v2665_v53 = vadd.f32 %v893_v51, %v805_v45  ;;  %v1548_v31 = vmul.f32 -1.442695, %v2659_v50 }
 0x2e3   : > { %v895_v54 = vpop.f32.mrf.mxu0 }
 0x2e4   : > { %v2667_v55 = vadd.f32 %v895_v54, %v809_v46  ;;  %967 = vrot.lane.b32.xlu1 %v2665_v53, %s2989_s9  ;;  %905 = vrot.lane.b32.xlu0 %v2654_v48, %s2989_s9  ;;  %1062 = vst.msk [vmem:[%s2674_s22] sm:$0xf] %vm1037_vm1, %v1577_v52  ;;  %1769 = vpow2.f32 %v1548_v31 }
 0x2e6   : > { %v1578_v57 = vpack.c.bf16 %v2667_v55, %v2667_v55  ;;  %v1549_v32 = vmul.f32 -1.442695, %v2667_v55 }
 0x2e8   : > { %921 = vrot.lane.b32.xlu0 %v900_v56, %s2233_s4  ;;  %1063 = vst.msk [vmem:[%s2674_s22 + $0x4] sm:$0xf] %vm1037_vm1, %v1578_v57  ;;  %1771 = vpow2.f32 %v1549_v32 }
 0x2f1   : > { %v1770_v33 = vpop.eup %1769 }
 0x2f2   : > { %v1070_v34 = vadd.f32 1.0, %v1770_v33 }
 0x2f4   : > { %1773 = vrcp.f32 %v1070_v34 }
 0x2f5   : > { %v1772_v35 = vpop.eup %1771 }
 0x2f6   : > { %v1071_v37 = vadd.f32 1.0, %v1772_v35 }
 0x2f8   : > { %1775 = vrcp.f32 %v1071_v37 }
 0x301   : > { %v1774_v56 = vpop.eup %1773 }
 0x352   : > { %v966_v58 = vpop.permute.xlu0 %965 }
 0x353   : > { %971 = vrot.lane.b32.xlu1 %v966_v58, %s2989_s9 }
 0x356   : > { %v968_v59 = vpop.permute.xlu1 %967  ;;  %v906_v2 = vpop.permute.xlu0 %905 }
 0x357   : > { %974 = vrot.lane.b32.xlu1 %v968_v59, %s2989_s9  ;;  %v907_v4 = vsel %vm904_vm2, %v906_v2, %v2654_v48 }
 0x35a   : > { %v922_v9 = vpop.permute.xlu0 %921 }
 0x35b   : > { %908 = vrot.lane.b32.xlu1 %v2665_v53, %s2989_s9 }
 0x35f   : > { %923 = vrot.lane.b32.xlu1 %v901_v60, %s2233_s4 }
 0x3c5   : > { %v972_v61 = vpop.permute.xlu1 %971 }
 0x3c6   : > { %v973_v62 = vsel %vm904_vm2, %v972_v61, %v966_v58 }
 0x3c7   : > { %977 = vrot.lane.b32.xlu0 %v973_v62, %s2989_s9 }
 0x3c9   : > { %v975_v0 = vpop.permute.xlu1 %974 }
 0x3ca   : > { %v976_v1 = vsel %vm904_vm2, %v975_v0, %v968_v59  ;;  %v1776_v0 = vpop.eup %1775 }
 0x3cb   : > { %941 = vrot.lane.b32.xlu0 %v902_v63, %s2234_s19  ;;  %979 = vrot.lane.b32.xlu1 %v976_v1, %s2989_s9  ;;  %v1076_v63 = vmul.f32 %v1774_v56, %v2659_v50  ;;  %v959_v1 = vld [vmem:[%s640_s23] sm:$0xff]  ;;  %v1077_v50 = vmul.f32 %v1776_v0, %v2667_v55 }
 0x3cd   : > { %v909_v5 = vpop.permute.xlu1 %908 }
 0x3ce   : > { %v910_v7 = vsel %vm904_vm2, %v909_v5, %v2665_v53 }
 0x3cf   : > { %911 = vrot.lane.b32.xlu0 %v907_v4, %s2989_s9  ;;  %943 = vrot.lane.b32.xlu1 %v903_v3, %s2234_s19 }
 0x3d1   : > { %v924_v10 = vpop.permute.xlu1 %923 }
 0x3d3   : > { %985 = vrot.lane.b32.xlu0 %v2705_v6, %s2989_s9  ;;  %913 = vrot.lane.b32.xlu1 %v910_v7, %s2989_s9  ;;  %v960_v7 = vld [vmem:[%s640_s23 + $0x8] sm:$0xff] }
 0x3d7   : > { %987 = vrot.lane.b32.xlu1 %v2714_v8, %s2989_s9 }
 0x439   : > { %v978_v11 = vpop.permute.xlu0 %977 }
 0x43a   : > { %v981_v12 = vsel %vm904_vm2, %v978_v11, %v966_v58 }
 0x43b   : > { %v993_v13 = vmul.f32 %v981_v12, %v922_v9 }
 0x43d   : > { %997 = vrot.lane.b32.xlu0 %v993_v13, %s2234_s19  ;;  %v942_v14 = vpop.permute.xlu0 %941  ;;  %v980_v15 = vpop.permute.xlu1 %979 }
 0x43e   : > { %v1005_v16 = vmul.f32 %v981_v12, %v942_v14  ;;  %v982_v17 = vsel %vm904_vm2, %v980_v15, %v968_v59  ;;  %v917_v59 = vmul.f32 %v2705_v6, %v2654_v48 }
 0x43f   : > { %v994_v18 = vmul.f32 %v982_v17, %v924_v10 }
 0x441   : > { %1009 = vrot.lane.b32.xlu0 %v1005_v16, %s2233_s4  ;;  %v912_v19 = vpop.permute.xlu0 %911  ;;  %999 = vrot.lane.b32.xlu1 %v994_v18, %s2234_s19  ;;  %v944_v20 = vpop.permute.xlu1 %943 }
 0x442   : > { %v1006_v21 = vmul.f32 %v982_v17, %v944_v20  ;;  %v915_v23 = vsel %vm904_vm2, %v912_v19, %v2654_v48 }
 0x443   : > { %v927_v26 = vmul.f32 %v922_v9, %v915_v23  ;;  %v947_v28 = vmul.f32 %v942_v14, %v915_v23 }
 0x445   : > { %1021 = vrot.lane.b32.xlu0 %v1017_v22, %s2989_s9  ;;  %1011 = vrot.lane.b32.xlu1 %v1006_v21, %s2233_s4  ;;  %v914_v24 = vpop.permute.xlu1 %913  ;;  %v986_v36 = vpop.permute.xlu0 %985  ;;  %s3069_s4 = sld [smem:[#allocation54_spill]] }
 0x446   : > { %v916_v27 = vsel %vm904_vm2, %v914_v24, %v2665_v53  ;;  %v991_v40 = vmul.f32 %v986_v36, %v2654_v48  ;;  %v918_v48 = vmul.f32 %v2714_v8, %v2665_v53 }
 0x447   : > { %v928_v29 = vmul.f32 %v924_v10, %v916_v27  ;;  %v948_v30 = vmul.f32 %v944_v20, %v916_v27 }
 0x449   : > { %931 = vrot.lane.b32.xlu0 %v927_v26, %s2235_s7  ;;  %1023 = vrot.lane.b32.xlu1 %v1018_v25, %s2989_s9  ;;  %v988_v38 = vpop.permute.xlu1 %987 }
 0x44a   : > { %v992_v44 = vmul.f32 %v988_v38, %v2665_v53 }
 0x44b   : > { %s2765_s19 = scalar_lea.hbm %s3069_s4, %s2756_s1 }
 0x44d   : > { %951 = vrot.lane.b32.xlu0 %v947_v28, %s2236_s3  ;;  %933 = vrot.lane.b32.xlu1 %v928_v29, %s2235_s7  ;;  %s1089_s7 = scalar_lea.sflag [#allocation4], %s2604_s29 }
 0x451   : > { %953 = vrot.lane.b32.xlu1 %v948_v30, %s2236_s3  ;;  %s1997_s3 = scalar_lea.vmem %s2759_s21, 128 }
 0x452   : > { %p1998_p5 = scmp.ne.s32.totalorder %s2759_s21, %s1997_s3  ;;  %p2005_p7 = scmp.lt.s32.totalorder %s2003_s13, %s1997_s3 }
 0x454   : > { %p1999_p1 = pnand %p1998_p5, %p2519_p12  ;;  %p2006_p8 = por %p2005_p7, %p2004_p10 }
 0x456   : > { %p2000_p6 = pneg %p1999_p1 }
 0x458   : > { %p2007_p11 = pnand %p2006_p8, %p2000_p6 }
 0x4af   : > { %v998_v39 = vpop.permute.xlu0 %997 }
 0x4b0   : > { %v1003_v43 = vadd.f32 %v998_v39, %v991_v40 }
 0x4b3   : > { %v1010_v41 = vpop.permute.xlu0 %1009  ;;  %v1000_v42 = vpop.permute.xlu1 %999 }
 0x4b4   : > { %v1015_v45 = vadd.f32 %v1010_v41, %v1003_v43  ;;  %v1004_v49 = vadd.f32 %v1000_v42, %v992_v44 }
 0x4b7   : > { %v1022_v46 = vpop.permute.xlu0 %1021  ;;  %v1012_v47 = vpop.permute.xlu1 %1011 }
 0x4b8   : > { %v1027_v51 = vmul.f32 %v1022_v46, %v1015_v45  ;;  %v1016_v54 = vadd.f32 %v1012_v47, %v1004_v49 }
 0x4ba   : > { %v1575_v52 = vpack.c.bf16 %v1027_v51, %v1027_v51 }
 0x4bb   : > { %v932_v57 = vpop.permute.xlu0 %931  ;;  %v1024_v58 = vpop.permute.xlu1 %1023 }
 0x4bc   : > { %v1028_v60 = vmul.f32 %v1024_v58, %v1016_v54  ;;  %1046 = vrot.lane.b32.xlu0 %v1575_v52, %s2989_s9  ;;  %v937_v61 = vadd.f32 %v932_v57, %v917_v59 }
 0x4be   : > { %v1576_v62 = vpack.c.bf16 %v1028_v60, %v1028_v60 }
 0x4bf   : > { %v952_v2 = vpop.permute.xlu0 %951  ;;  %v934_v3 = vpop.permute.xlu1 %933 }
 0x4c0   : > { %v957_v4 = vadd.f32 %v952_v2, %v937_v61  ;;  %1080 = vrot.lane.b32.xlu0 %v1076_v63, %s2989_s9  ;;  %1048 = vrot.lane.b32.xlu1 %v1576_v62, %s2989_s9  ;;  %v938_v6 = vadd.f32 %v934_v3, %v918_v48 }
 0x4c2   : > { %v961_v5 = vmul.f32 %v959_v1, %v957_v4 }
 0x4c3   : > { %v954_v9 = vpop.permute.xlu1 %953 }
 0x4c4   : > { %v1573_v10 = vpack.c.bf16 %v961_v5, %v961_v5  ;;  %v958_v11 = vadd.f32 %v954_v9, %v938_v6  ;;  %1082 = vrot.lane.b32.xlu1 %v1077_v50, %s2989_s9 }
 0x4c6   : > { %v962_v53 = vmul.f32 %v960_v7, %v958_v11  ;;  %1038 = vst.msk [vmem:[%s710_s25] sm:$0xf] %vm1037_vm1, %v1573_v10 }
 0x4c8   : > { %v1574_v55 = vpack.c.bf16 %v962_v53, %v962_v53 }
 0x4ca   : > { %1039 = vst.msk [vmem:[%s710_s25 + $0x4] sm:$0xf] %vm1037_vm1, %v1574_v55 }
 0x4cb   : > { %2010 = shalt.err (!%p2007_p11)
}
 0x4cc   : > { %s2011_s15 = scalar_lea.hbm %s2765_s19, 128  ;;  %s2015_s23 = scalar_lea.hbm %s3069_s4, 512 }
 0x4cd   : > { %p2012_p9 = scmp.ne.s32.totalorder %s2765_s19, %s2011_s15  ;;  %p2016_p0 = scmp.lt.s32.totalorder %s2765_s19, %s3069_s4 }
 0x4ce   : > { %p2017_p13 = scmp.lt.s32.totalorder %s2015_s23, %s2011_s15 }
 0x4cf   : > { %p2013_p3 = pnand %p2012_p9, %p2519_p12 }
 0x4d0   : > { %p2018_p2 = por %p2017_p13, %p2016_p0 }
 0x4d1   : > { %p2014_p4 = pneg %p2013_p3 }
 0x4d3   : > { %p2019_p5 = pnand %p2018_p2, %p2014_p4 }
 0x4d5   : > { %2022 = shalt.err (!%p2019_p5)
}
 0x4d6   : > { %s2991_s3 = smov 4   ;;  %s717_s14 = scalar_lea.vmem [#allocation17], %s2657_s28 }
 0x4d7   : > { %1599 = dma.vmem_to_hbm [thread:$0]  (%p2519_p12), %s2759_s21, 128, %s2765_s19, %s1089_s7, %s2989_s9, %s2989_s9, %s2991_s3  }
 0x4d8   : > { %s1137_s24 = sshll.u32 %s717_s14, 4  ;;  %s1155_s13 = sshll.u32 %s2674_s22, 4  ;;  %s2801_s24 = int_to_ptr.vmem [resolvable:$true] %s1137_s24  ;;  %s2803_s13 = int_to_ptr.vmem [resolvable:$true] %s1155_s13 }
 0x4d9   : > { %s3070_s15 = sshll.u32 %s2604_s29, 4  ;;  %s1565_s28 = sshll.u32 %s2749_s2, 7 }
 0x4da   : > { %s2798_s25 = scalar_lea.vmem [#allocation20], %s3070_s15  ;;  %s3071_s19 = sld [smem:[#allocation55_spill]] }
 0x4db   : > { %s1173_s20 = sshll.u32 %s2798_s25, 4  ;;  %s3072_s15 = sld [smem:[#allocation56_spill]]  ;;  %s2807_s20 = int_to_ptr.vmem [resolvable:$true] %s1173_s20 }
 0x4dc   : > { %s3074_s6 = sld [smem:[#allocation57_spill]]  ;;  %s1094_s2 = scalar_lea.sflag [#allocation18], %s2619_s8 }
 0x4dd   : > { %s2023_s22 = scalar_lea.vmem %s2801_s24, 128  ;;  %s2239_s21 = smov [#allocation17]  }
 0x4de   : > { %p2024_p1 = scmp.ne.s32.totalorder %s2801_s24, %s2023_s22 }
 0x4e0   : > { %s2813_s7 = scalar_lea.hbm %s3071_s19, %s2756_s1  ;;  %p2025_p6 = pnand %p2024_p1, %p2519_p12 }
 0x4e1   : > { %s3073_s9 = smov %s3072_s15  ;;  %s2819_s3 = scalar_lea.hbm %s3072_s15, %s2756_s1 }
 0x4e2   : > { %s2824_s12 = scalar_lea.hbm %s3074_s6, %s1565_s28  ;;  %p2026_p10 = pneg %p2025_p6 }
 0x4e3   : > { %s2027_s1 = sshll.u32 %s2239_s21, 4  ;;  %s2028_s1 = int_to_ptr.vmem [resolvable:$false] %s2027_s1 }
 0x4e4   : > { %s2029_s23 = scalar_lea.vmem %s2028_s1, 256  ;;  %p2030_p7 = scmp.lt.s32.totalorder %s2801_s24, %s2028_s1 }
 0x4e5   : > { %p2031_p8 = scmp.lt.s32.totalorder %s2029_s23, %s2023_s22 }
 0x4e7   : > { %p2032_p11 = por %p2031_p8, %p2030_p7 }
 0x4e9   : > { %p2033_p9 = pnand %p2032_p11, %p2026_p10 }
 0x52e   : > { %v1047_v8 = vpop.permute.xlu0 %1046 }
 0x52f   : > { %1052 = vst.msk [vmem:[%s717_s14] sm:$0xf] %vm1037_vm1, %v1047_v8 }
 0x532   : > { %v1081_v12 = vpop.permute.xlu0 %1080  ;;  %v1049_v13 = vpop.permute.xlu1 %1048 }
 0x533   : > { %1086 = vst.msk [vmem:[%s2798_s25] sm:$0xff] %vm747_vm0, %v1081_v12 }
 0x534   : > { %1053 = vst.msk [vmem:[%s717_s14 + $0x4] sm:$0xf] %vm1037_vm1, %v1049_v13 }
 0x535   : > { %2036 = shalt.err (!%p2033_p9)
}
 0x536   : > { %s2037_s0 = scalar_lea.hbm %s2813_s7, 128  ;;  %s2041_s28 = scalar_lea.hbm %s3071_s19, 512 }
 0x537   : > { %p2038_p3 = scmp.ne.s32.totalorder %s2813_s7, %s2037_s0  ;;  %p2042_p13 = scmp.lt.s32.totalorder %s2813_s7, %s3071_s19 }
 0x538   : > { %p2043_p2 = scmp.lt.s32.totalorder %s2041_s28, %s2037_s0 }
 0x539   : > { %p2039_p4 = pnand %p2038_p3, %p2519_p12 }
 0x53a   : > { %p2044_p5 = por %p2043_p2, %p2042_p13 }
 0x53b   : > { %p2040_p0 = pneg %p2039_p4 }
 0x53d   : > { %p2045_p1 = pnand %p2044_p5, %p2040_p0 }
 0x53f   : > { %2048 = shalt.err (!%p2045_p1)
}
 0x540   : > { %s3075_s22 = smov 4   ;;  %s3076_s21 = smov 64  }
 0x541   : > { %1600 = dma.vmem_to_hbm [thread:$0]  (%p2519_p12), %s2801_s24, 128, %s2813_s7, %s1094_s2, %s3076_s21, %s3076_s21, %s3075_s22  }
 0x542   : > { %s2049_s1 = scalar_lea.vmem %s2803_s13, 128  ;;  %s2240_s23 = smov [#allocation19]  }
 0x543   : > { %p2050_p6 = scmp.ne.s32.totalorder %s2803_s13, %s2049_s1  ;;  %s2053_s0 = sshll.u32 %s2240_s23, 4  ;;  %s2054_s0 = int_to_ptr.vmem [resolvable:$false] %s2053_s0 }
 0x544   : > { %s2055_s4 = scalar_lea.vmem %s2054_s0, 256  ;;  %p2056_p8 = scmp.lt.s32.totalorder %s2803_s13, %s2054_s0 }
 0x545   : > { %p2051_p10 = pnand %p2050_p6, %p2519_p12  ;;  %p2057_p11 = scmp.lt.s32.totalorder %s2055_s4, %s2049_s1 }
 0x547   : > { %p2052_p7 = pneg %p2051_p10  ;;  %p2058_p9 = por %p2057_p11, %p2056_p8 }
 0x549   : > { %p2059_p3 = pnand %p2058_p9, %p2052_p7 }
 0x54b   : > { %2062 = shalt.err (!%p2059_p3)
}
 0x54c   : > { %s2063_s14 = scalar_lea.hbm %s2819_s3, 128  ;;  %s2067_s28 = scalar_lea.hbm %s3073_s9, 512 }
 0x54d   : > { %p2064_p4 = scmp.ne.s32.totalorder %s2819_s3, %s2063_s14  ;;  %p2068_p2 = scmp.lt.s32.totalorder %s2819_s3, %s3073_s9 }
 0x54e   : > { %p2069_p5 = scmp.lt.s32.totalorder %s2067_s28, %s2063_s14 }
 0x54f   : > { %p2065_p0 = pnand %p2064_p4, %p2519_p12 }
 0x550   : > { %p2070_p1 = por %p2069_p5, %p2068_p2 }
 0x551   : > { %p2066_p13 = pneg %p2065_p0 }
 0x553   : > { %p2071_p6 = pnand %p2070_p1, %p2066_p13 }
 0x555   : > { %2074 = shalt.err (!%p2071_p6)
}
 0x556   : > { %1601 = dma.vmem_to_hbm [thread:$0]  (%p2519_p12), %s2803_s13, 128, %s2819_s3, %s1094_s2, %s3076_s21, %s3076_s21, %s3075_s22   ;;  %v1083_v14 = vpop.permute.xlu1 %1082 }
 0x557   : > { %1087 = vst.msk [vmem:[%s2798_s25 + $0x8] sm:$0xff] %vm747_vm0, %v1083_v14  ;;  %s1104_s1 = scalar_lea.sflag [#allocation21], %s2604_s29  ;;  %s2075_s23 = scalar_lea.vmem %s2807_s20, 256 }
 0x558   : > { %p2076_p10 = scmp.ne.s32.totalorder %s2807_s20, %s2075_s23  ;;  %s2241_s0 = smov [#allocation20]  }
 0x559   : > { %s2079_s8 = sshll.u32 %s2241_s0, 4  ;;  %s2080_s8 = int_to_ptr.vmem [resolvable:$false] %s2079_s8 }
 0x55a   : > { %p2077_p7 = pnand %p2076_p10, %p2519_p12  ;;  %s2081_s4 = scalar_lea.vmem %s2080_s8, 512 }
 0x55b   : > { %p2082_p11 = scmp.lt.s32.totalorder %s2807_s20, %s2080_s8  ;;  %p2083_p9 = scmp.lt.s32.totalorder %s2081_s4, %s2075_s23 }
 0x55c   : > { %p2078_p8 = pneg %p2077_p7 }
 0x55d   : > { %p2084_p3 = por %p2083_p9, %p2082_p11 }
 0x55f   : > { %p2085_p4 = pnand %p2084_p3, %p2078_p8 }
 0x561   : > { %2088 = shalt.err (!%p2085_p4)
}
 0x562   : > { %s2089_s3 = scalar_lea.hbm %s2824_s12, 256  ;;  %s2093_s2 = scalar_lea.hbm %s3074_s6, 1024 }
 0x563   : > { %p2090_p0 = scmp.ne.s32.totalorder %s2824_s12, %s2089_s3  ;;  %p2094_p5 = scmp.lt.s32.totalorder %s2824_s12, %s3074_s6 }
 0x564   : > { %p2095_p1 = scmp.lt.s32.totalorder %s2093_s2, %s2089_s3 }
 0x565   : > { %p2091_p13 = pnand %p2090_p0, %p2519_p12 }
 0x566   : > { %p2096_p6 = por %p2095_p1, %p2094_p5 }
 0x567   : > { %p2092_p2 = pneg %p2091_p13 }
 0x569   : > { %p2097_p10 = pnand %p2096_p6, %p2092_p2 }
 0x56b   : > { %2100 = shalt.err (!%p2097_p10)
}
 0x56c   : > { %s2242_s14 = smov 128   ;;  %s2243_s24 = smov 8  }
 0x56d   : > { %1602 = dma.vmem_to_hbm [thread:$0]  (%p2519_p12), %s2807_s20, 256, %s2824_s12, %s1104_s1, %s2242_s14, %s2242_s14, %s2243_s24  }
 0x56e PF: > { %s3077_s7 = sld [smem:[#allocation31_spill]]  ;;  %p1651_p7 = scmp.ge.s32.totalorder %s2219_s18, 2 }
 0x56f   : > { %s3078_s28 = sld [smem:[#allocation38_spill]] }
 0x574   : > { %s1188_s10 = sand.u32 1, %s3077_s7  }
 0x575   : > { %p3079_p8 = scmp.ne.s32.totalorder %s3078_s28, 0  ;;  %s1189_s15 = scalar_lea.sflag [#allocation4], %s1188_s10 }
 0x577   : > { %p1634_p11 = pnand %p1651_p7, %p3079_p8 }
 0x579   : > { %p1635_p9 = pneg %p1634_p11 }
 0x57b   : > { %2166 = dma.done.wait (%p1635_p9), %s1189_s15, 128  }
 0x57c   : > { %2168 = vsyncadd (%p1635_p9), %s1189_s15, 4294967168  ;;  %s3080_s23 = sadd.s32 4294967294, %s2219_s18  }
 0x57d   : > { %s1197_s0 = sand.u32 1, %s3080_s23  }
 0x57e   : > { %s1198_s8 = scalar_lea.sflag [#allocation18], %s1197_s0 }
 0x57f   : > { %2170 = dma.done.wait (%p1635_p9), %s1198_s8, 256  }
 0x580   : > { %2172 = vsyncadd (%p1635_p9), %s1198_s8, 4294967040  ;;  %s1216_s29 = scalar_lea.sflag [#allocation21], %s1188_s10 }
 0x581   : > { %2174 = dma.done.wait (%p1635_p9), %s1216_s29, 256  }
 0x582   : > { %2176 = vsyncadd (%p1635_p9), %s1216_s29, 4294967040  ;;  %s46_s18 = sadd.s32 1, %s2219_s18   ;;  %s3081_s25 = sld [smem:[#allocation30_spill]] }
 0x583   : > { %p43_p12 = scmp.ge.s32.totalorder %s46_s18, 6   ;;  %s3082_s12 = smov %s2529_s26 }
 0x584   : > { %s3083_s28 = sld [smem:[#allocation32_spill]]  ;;  %s3086_s26 = smov %s2187_s27 }
 0x585   : > { %s3084_s11 = sld [smem:[#allocation41_spill]]  ;;  %s3087_s27 = smov %s3082_s12 }
 0x586   : > { %s3085_s20 = sld [smem:[#allocation43_spill]]  ;;  %s3088_s29 = smov %s2199_s30 }
 0x587   : > { %s3089_s30 = smov %s2536_s5  ;;  %s3090_s14 = smov %s2211_s16 }
 0x588   : > { %s3091_s15 = smov %s2215_s17  ;;  %45 = sbr.rel (!%p43_p12) target bundleno = 35 (0x23), region = 223 }
 0x58b   : > { %s3092_s16 = smov %s3084_s11 }
 0x58c   : > { %s3093_s17 = smov %s3085_s20 }
 0x58d   :  { %1221 = vsyncpa [#allocation3], 1 }
 0x58e   :  { %1223 = vsyncpa [#allocation3 + $0x1], 1 }
 0x58f   :  { %1224 = vsyncpa [#allocation6], 1 }
 0x590   :  { %1225 = vsyncpa [#allocation9], 1 }
 0x591   :  { %1227 = vsyncpa [#allocation9 + $0x1], 1 }
 0x592   :  { %1228 = vsyncpa [#allocation12], 1 }
 0x593   :  { %1230 = vsyncpa [#allocation12 + $0x1], 1 }
 0x594   :  { %1231 = vsyncpa [#allocation15], 1 }
 0x595   :  { %1233 = vsyncpa [#allocation15 + $0x1], 1 }
 0x596   :  { %1234 = vsyncpa [#allocation4], 1 }
 0x597   :  { %1236 = vsyncpa [#allocation4 + $0x1], 1 }
 0x598   :  { %1237 = vsyncpa [#allocation18], 1 }
 0x599   :  { %1239 = vsyncpa [#allocation18 + $0x1], 1 }
 0x59a   :  { %1240 = vsyncpa [#allocation21], 1 }
 0x59b   :  { %1242 = vsyncpa [#allocation21 + $0x1], 1 }

</bundles_post_ra>
